<compile_context>
chip_gen: v7x
topology: tpu7x:2x2x1
jax: 0.10.0
libtpu: 0.0.40
codegen_flags: <defaults>
</compile_context>

<pallas_src>
import functools

import jax
import jax.numpy as jnp
from jax.experimental import pallas as pl
from jax.experimental.pallas import tpu as pltpu


def _round_up(x, m):
    return (x + m - 1) // m * m


def basic_conv_kernel(x_ref, w_ref, shift_ref, o_ref, lhs_ref, acc_ref,
                      *, K, TH, Wq):
    """One (batch n, row-tile r) step of conv(KxK, stride 1, SAME) + BN + ReLU.

    x_ref:     (1, Hq + 2*pad, Wq, Cin_p)  bf16  padded image of batch n
    w_ref:     (K, K*Cin_p, Cout_p)        bf16  [kw, kh*Cin_p + ci, co], BN scale folded
    shift_ref: (1, Cout_p)                 f32   folded BN shift
    o_ref:     (1, TH, Wq, Cout_p)         f32   output row tile
    lhs_ref:   (TH*Wq, K*Cin_p)            bf16  scratch: wide LHS (kh folded)
    acc_ref:   (TH*Wq, Cout_p)             f32   scratch accumulator
    """
    r = pl.program_id(1)
    row0 = pl.multiple_of(r * TH, TH)
    Cin_p = x_ref.shape[-1]
    Cout_p = w_ref.shape[-1]
    n_rows = TH * Wq

    # Wide LHS: the K vertical taps are whole-row (tile-aligned) slabs placed at
    # lane offsets kh*Cin_p -> folded into the MXU contraction, no relayouts.
    for kh in range(K):                               # static unroll
        lhs_ref[:, kh * Cin_p:(kh + 1) * Cin_p] = (
            x_ref[0, pl.ds(row0 + kh, TH), :, :].reshape(n_rows, Cin_p))
    lhs = lhs_ref[...]

    # K MXU matmuls: (TH*Wq, K*Cin_p) @ (K*Cin_p, Cout_p), f32 accumulation.
    acc_ref[...] = jnp.dot(lhs, w_ref[0], preferred_element_type=jnp.float32)
    for kw in range(1, K):                            # static unroll
        p = jnp.dot(lhs, w_ref[kw], preferred_element_type=jnp.float32)
        # Output (t, w) needs p[t*Wq + w + kw]: add p shifted up by kw rows.
        # (pltpu.roll(p, n_rows - kw, axis=0) is the XLU-native equivalent.)
        # Rows >= n_rows - kw only feed discarded output columns (w >= W).
        acc_ref[:n_rows - kw, :] = acc_ref[:n_rows - kw, :] + p[kw:, :]

    # BatchNorm (scale already folded into weights) shift + ReLU epilogue.
    y = jnp.maximum(acc_ref[...] + shift_ref[...], 0.0)
    o_ref[...] = y.reshape(1, TH, Wq, Cout_p).astype(o_ref.dtype)


def basic_conv(x_nchw, weight_oihw, gamma, beta, running_mean, running_var,
               *, stride=1, eps=1e-5, row_tile=8):
    """BasicConv.forward: Conv2d(bias=False, padding=(K-1)//2) -> BN(eval) -> ReLU."""
    # TODO(synk): stride > 1 not implemented (module default is stride=1).
    assert stride == 1, "only stride=1 supported"
    N, Cin, H, W = x_nchw.shape
    Cout, Cin_w, K, K2 = weight_oihw.shape
    assert Cin_w == Cin and K == K2
    assert K % 2 == 1, "padding=(K-1)//2 matches SAME conv only for odd K"
    pad = (K - 1) // 2

    LANE = 128
    Cin_p = _round_up(Cin, LANE)
    Cout_p = _round_up(Cout, LANE)
    TH = row_tile
    Hq = _round_up(H, TH)                       # output rows, tiled by TH
    Wq = _round_up(W + 2 * pad, 8)              # padded width, sublane-aligned

    # ---- input: NCHW -> NHWC, spatial + channel pad, cast to bf16 (MXU) ----
    x = jnp.transpose(x_nchw, (0, 2, 3, 1))
    x = jnp.pad(x, ((0, 0),
                    (pad, pad + (Hq - H)),
                    (pad, Wq - W - pad),
                    (0, Cin_p - Cin))).astype(jnp.bfloat16)

    # ---- weights: OIHW -> (KH,KW,Cin,Cout), fold BN scale, pad channels,
    #      fold kh into the contraction axis: (KW, KH*Cin_p, Cout_p), bf16 ----
    scale = gamma / jnp.sqrt(running_var + eps)
    shift = beta - running_mean * scale
    w = jnp.transpose(weight_oihw, (2, 3, 1, 0)) * scale[None, None, None, :]
    w = jnp.pad(w, ((0, 0), (0, 0), (0, Cin_p - Cin), (0, Cout_p - Cout)))
    w = jnp.transpose(w, (1, 0, 2, 3)).reshape(K, K * Cin_p, Cout_p)
    w = w.astype(jnp.bfloat16)

    shift_p = jnp.pad(shift, (0, Cout_p - Cout)).reshape(1, Cout_p)
    shift_p = shift_p.astype(jnp.float32)

    kern = functools.partial(basic_conv_kernel, K=K, TH=TH, Wq=Wq)
    n_row_tiles = Hq // TH

    # TODO(synk): for very large H*W images, switch the x BlockSpec to a halo'd
    # row tile (pl.Element on H, or manual DMA) so VMEM stays bounded on v7x.
    out_k = pl.pallas_call(
        kern,
        out_shape=jax.ShapeDtypeStruct((N, Hq, Wq, Cout_p), jnp.float32),
        grid=(N, n_row_tiles),
        in_specs=[
            pl.BlockSpec((1, Hq + 2 * pad, Wq, Cin_p), lambda n, r: (n, 0, 0, 0)),
            pl.BlockSpec((K, K * Cin_p, Cout_p), lambda n, r: (0, 0, 0)),
            pl.BlockSpec((1, Cout_p), lambda n, r: (0, 0)),
        ],
        out_specs=pl.BlockSpec((1, TH, Wq, Cout_p), lambda n, r: (n, r, 0, 0)),
        scratch_shapes=[
            pltpu.VMEM((TH * Wq, K * Cin_p), jnp.bfloat16),
            pltpu.VMEM((TH * Wq, Cout_p), jnp.float32),
        ],
        compiler_params=pltpu.CompilerParams(
            dimension_semantics=("parallel", "parallel"),
            vmem_limit_bytes=64 * 1024 * 1024),
    )(x, w, shift_p)

    # Strip channel / spatial padding, back to NCHW.
    out = out_k[:, :H, :W, :Cout]
    return jnp.transpose(out, (0, 3, 1, 2))


if __name__ == "__main__":
    key = jax.random.PRNGKey(0)
    k1, k2, k3, k4 = jax.random.split(key, 4)

    # Small shapes consistent with BasicConv(inplanes=4, planes=8, kernel_size=3)
    N, Cin, H, W = 2, 4, 16, 16
    Cout, K = 8, 3

    x = jax.random.normal(k1, (N, Cin, H, W), jnp.float32)
    weight = jax.random.normal(k2, (Cout, Cin, K, K), jnp.float32) * 0.1
    gamma = 1.0 + 0.1 * jax.random.normal(k3, (Cout,), jnp.float32)
    beta = 0.1 * jax.random.normal(k4, (Cout,), jnp.float32)
    running_mean = jnp.zeros((Cout,), jnp.float32)
    running_var = jnp.ones((Cout,), jnp.float32)

    fn = jax.jit(basic_conv)
    out = fn(x, weight, gamma, beta, running_mean, running_var)
    out = jax.block_until_ready(out)

    # Pure-JAX f32 reference for correctness.
    ref = jax.lax.conv_general_dilated(
        x, weight, window_strides=(1, 1), padding="SAME",
        dimension_numbers=("NCHW", "OIHW", "NCHW"))
    r_scale = gamma / jnp.sqrt(running_var + 1e-5)
    r_shift = beta - running_mean * r_scale
    ref = jnp.maximum(ref * r_scale[None, :, None, None]
                      + r_shift[None, :, None, None], 0.0)

    assert out.shape == (N, Cout, H, W)
    # bf16 matmul operands -> loosened tolerance vs the f32 reference.
    assert jnp.allclose(out, ref, atol=5e-2, rtol=5e-2), (
        f"mismatch vs reference: max abs err {jnp.max(jnp.abs(out - ref))}")
    print("KERNEL_OK")
</pallas_src>

<mosaic_0001>
module attributes {stable_mosaic.version = 11 : i64} {
  func.func @basic_conv_kernel(%arg0: i32, %arg1: i32, %arg2: memref<1x18x24x128xbf16, #tpu.memory_space<vmem>>, %arg3: memref<3x384x128xbf16, #tpu.memory_space<vmem>>, %arg4: memref<1x128xf32, #tpu.memory_space<vmem>>, %arg5: memref<1x8x24x128xf32, #tpu.memory_space<vmem>>, %arg6: memref<192x384xbf16, #tpu.memory_space<vmem>>, %arg7: memref<192x128xf32, #tpu.memory_space<vmem>>) attributes {dimension_semantics = [#tpu.dimension_semantics<parallel>, #tpu.dimension_semantics<parallel>], iteration_bounds = array<i64: 2, 2>, scalar_prefetch = 0 : i64, scratch_operands = 2 : i64, tpu.core_type = #tpu.core_type<tc>, window_params = [{transform_indices = @transform_0, window_bounds = array<i64: 1, 18, 24, 128>}, {pipeline_mode = #tpu.pipeline_mode<synchronous>, transform_indices = @transform_1, window_bounds = array<i64: 3, 384, 128>}, {pipeline_mode = #tpu.pipeline_mode<synchronous>, transform_indices = @transform_2, window_bounds = array<i64: 1, 128>}, {transform_indices = @transform_3, window_bounds = array<i64: 1, 8, 24, 128>}]} {
    %c8_i32 = arith.constant 8 : i32
    %0 = arith.muli %arg1, %c8_i32 : i32
    %1 = tpu.assume_multiple %0, 8 : i32
    %c0_i32 = arith.constant 0 : i32
    %2 = arith.addi %1, %c0_i32 : i32
    %c0 = arith.constant 0 : index
    %3 = arith.index_cast %2 : i32 to index
    %c0_0 = arith.constant 0 : index
    %c0_1 = arith.constant 0 : index
    %4 = vector.load %arg2[%c0, %3, %c0_0, %c0_1] : memref<1x18x24x128xbf16, #tpu.memory_space<vmem>>, vector<1x8x24x128xbf16>
    %5 = vector.shape_cast %4 : vector<1x8x24x128xbf16> to vector<8x24x128xbf16>
    %6 = vector.shape_cast %5 : vector<8x24x128xbf16> to vector<192x128xbf16>
    %c0_2 = arith.constant 0 : index
    %c0_3 = arith.constant 0 : index
    %7 = vector.load %arg6[%c0_2, %c0_3] : memref<192x384xbf16, #tpu.memory_space<vmem>>, vector<192x128xbf16>
    tpu.vector_store %arg6[%c0_2, %c0_3], %6 {strides = array<i32>} : memref<192x384xbf16, #tpu.memory_space<vmem>>, vector<192x128xbf16>,
    %c1_i32 = arith.constant 1 : i32
    %8 = arith.addi %1, %c1_i32 : i32
    %c0_4 = arith.constant 0 : index
    %9 = arith.index_cast %8 : i32 to index
    %c0_5 = arith.constant 0 : index
    %c0_6 = arith.constant 0 : index
    %10 = vector.load %arg2[%c0_4, %9, %c0_5, %c0_6] : memref<1x18x24x128xbf16, #tpu.memory_space<vmem>>, vector<1x8x24x128xbf16>
    %11 = vector.shape_cast %10 : vector<1x8x24x128xbf16> to vector<8x24x128xbf16>
    %12 = vector.shape_cast %11 : vector<8x24x128xbf16> to vector<192x128xbf16>
    %c0_7 = arith.constant 0 : index
    %c128 = arith.constant 128 : index
    %13 = vector.load %arg6[%c0_7, %c128] : memref<192x384xbf16, #tpu.memory_space<vmem>>, vector<192x128xbf16>
    tpu.vector_store %arg6[%c0_7, %c128], %12 {strides = array<i32>} : memref<192x384xbf16, #tpu.memory_space<vmem>>, vector<192x128xbf16>,
    %c2_i32 = arith.constant 2 : i32
    %14 = arith.addi %1, %c2_i32 : i32
    %c0_8 = arith.constant 0 : index
    %15 = arith.index_cast %14 : i32 to index
    %c0_9 = arith.constant 0 : index
    %c0_10 = arith.constant 0 : index
    %16 = vector.load %arg2[%c0_8, %15, %c0_9, %c0_10] : memref<1x18x24x128xbf16, #tpu.memory_space<vmem>>, vector<1x8x24x128xbf16>
    %17 = vector.shape_cast %16 : vector<1x8x24x128xbf16> to vector<8x24x128xbf16>
    %18 = vector.shape_cast %17 : vector<8x24x128xbf16> to vector<192x128xbf16>
    %c0_11 = arith.constant 0 : index
    %c256 = arith.constant 256 : index
    %19 = vector.load %arg6[%c0_11, %c256] : memref<192x384xbf16, #tpu.memory_space<vmem>>, vector<192x128xbf16>
    tpu.vector_store %arg6[%c0_11, %c256], %18 {strides = array<i32>} : memref<192x384xbf16, #tpu.memory_space<vmem>>, vector<192x128xbf16>,
    %c0_12 = arith.constant 0 : index
    %c0_13 = arith.constant 0 : index
    %20 = vector.load %arg6[%c0_12, %c0_13] : memref<192x384xbf16, #tpu.memory_space<vmem>>, vector<192x384xbf16>
    %c0_14 = arith.constant 0 : index
    %c0_15 = arith.constant 0 : index
    %c0_16 = arith.constant 0 : index
    %21 = vector.load %arg3[%c0_14, %c0_15, %c0_16] : memref<3x384x128xbf16, #tpu.memory_space<vmem>>, vector<1x384x128xbf16>
    %22 = vector.shape_cast %21 : vector<1x384x128xbf16> to vector<384x128xbf16>
    %cst = arith.constant dense<0.000000e+00> : vector<192x128xf32>
    %23 = tpu.matmul %20, %22, %cst {dimension_numbers = #tpu.dot_dimension_numbers<[1], [0], [0], [1], [0, 0, 1, 1], [], []>} : vector<192x384xbf16>, vector<384x128xbf16>, vector<192x128xf32> -> vector<192x128xf32>
    %c0_17 = arith.constant 0 : index
    %c0_18 = arith.constant 0 : index
    %24 = vector.load %arg7[%c0_17, %c0_18] : memref<192x128xf32, #tpu.memory_space<vmem>>, vector<192x128xf32>
    tpu.vector_store %arg7[%c0_17, %c0_18], %23 {strides = array<i32>} : memref<192x128xf32, #tpu.memory_space<vmem>>, vector<192x128xf32>,
    %c1 = arith.constant 1 : index
    %c0_19 = arith.constant 0 : index
    %c0_20 = arith.constant 0 : index
    %25 = vector.load %arg3[%c1, %c0_19, %c0_20] : memref<3x384x128xbf16, #tpu.memory_space<vmem>>, vector<1x384x128xbf16>
    %26 = vector.shape_cast %25 : vector<1x384x128xbf16> to vector<384x128xbf16>
    %cst_21 = arith.constant dense<0.000000e+00> : vector<192x128xf32>
    %27 = tpu.matmul %20, %26, %cst_21 {dimension_numbers = #tpu.dot_dimension_numbers<[1], [0], [0], [1], [0, 0, 1, 1], [], []>} : vector<192x384xbf16>, vector<384x128xbf16>, vector<192x128xf32> -> vector<192x128xf32>
    %c0_22 = arith.constant 0 : index
    %c0_23 = arith.constant 0 : index
    %28 = vector.load %arg7[%c0_22, %c0_23] : memref<192x128xf32, #tpu.memory_space<vmem>>, vector<191x128xf32>
    %29 = vector.extract_strided_slice %27 {offsets = [1, 0], sizes = [191, 128], strides = [1, 1]} : vector<192x128xf32> to vector<191x128xf32>
    %30 = arith.addf %28, %29 : vector<191x128xf32>
    %c0_24 = arith.constant 0 : index
    %c0_25 = arith.constant 0 : index
    %31 = vector.load %arg7[%c0_24, %c0_25] : memref<192x128xf32, #tpu.memory_space<vmem>>, vector<191x128xf32>
    tpu.vector_store %arg7[%c0_24, %c0_25], %30 {strides = array<i32>} : memref<192x128xf32, #tpu.memory_space<vmem>>, vector<191x128xf32>,
    %c2 = arith.constant 2 : index
    %c0_26 = arith.constant 0 : index
    %c0_27 = arith.constant 0 : index
    %32 = vector.load %arg3[%c2, %c0_26, %c0_27] : memref<3x384x128xbf16, #tpu.memory_space<vmem>>, vector<1x384x128xbf16>
    %33 = vector.shape_cast %32 : vector<1x384x128xbf16> to vector<384x128xbf16>
    %cst_28 = arith.constant dense<0.000000e+00> : vector<192x128xf32>
    %34 = tpu.matmul %20, %33, %cst_28 {dimension_numbers = #tpu.dot_dimension_numbers<[1], [0], [0], [1], [0, 0, 1, 1], [], []>} : vector<192x384xbf16>, vector<384x128xbf16>, vector<192x128xf32> -> vector<192x128xf32>
    %c0_29 = arith.constant 0 : index
    %c0_30 = arith.constant 0 : index
    %35 = vector.load %arg7[%c0_29, %c0_30] : memref<192x128xf32, #tpu.memory_space<vmem>>, vector<190x128xf32>
    %36 = vector.extract_strided_slice %34 {offsets = [2, 0], sizes = [190, 128], strides = [1, 1]} : vector<192x128xf32> to vector<190x128xf32>
    %37 = arith.addf %35, %36 : vector<190x128xf32>
    %c0_31 = arith.constant 0 : index
    %c0_32 = arith.constant 0 : index
    %38 = vector.load %arg7[%c0_31, %c0_32] : memref<192x128xf32, #tpu.memory_space<vmem>>, vector<190x128xf32>
    tpu.vector_store %arg7[%c0_31, %c0_32], %37 {strides = array<i32>} : memref<192x128xf32, #tpu.memory_space<vmem>>, vector<190x128xf32>,
    %c0_33 = arith.constant 0 : index
    %c0_34 = arith.constant 0 : index
    %39 = vector.load %arg7[%c0_33, %c0_34] : memref<192x128xf32, #tpu.memory_space<vmem>>, vector<192x128xf32>
    %c0_35 = arith.constant 0 : index
    %c0_36 = arith.constant 0 : index
    %40 = vector.load %arg4[%c0_35, %c0_36] : memref<1x128xf32, #tpu.memory_space<vmem>>, vector<1x128xf32>
    %41 = vector.broadcast %40 : vector<1x128xf32> to vector<192x128xf32>
    %42 = arith.addf %39, %41 : vector<192x128xf32>
    %cst_37 = arith.constant 0.000000e+00 : f32
    %43 = vector.broadcast %cst_37 : f32 to vector<192x128xf32>
    %44 = arith.maximumf %42, %43 : vector<192x128xf32>
    %45 = vector.shape_cast %44 : vector<192x128xf32> to vector<1x8x24x128xf32>
    %c0_38 = arith.constant 0 : index
    %c0_39 = arith.constant 0 : index
    %c0_40 = arith.constant 0 : index
    %c0_41 = arith.constant 0 : index
    %46 = vector.load %arg5[%c0_38, %c0_39, %c0_40, %c0_41] : memref<1x8x24x128xf32, #tpu.memory_space<vmem>>, vector<1x8x24x128xf32>
    tpu.vector_store %arg5[%c0_38, %c0_39, %c0_40, %c0_41], %45 {strides = array<i32>} : memref<1x8x24x128xf32, #tpu.memory_space<vmem>>, vector<1x8x24x128xf32>,
    return
  }
  func.func @transform_0(%arg0: i32, %arg1: i32) -> (i32, i32, i32, i32) {
    %c0_i32 = arith.constant 0 : i32
    %c0_i32_0 = arith.constant 0 : i32
    %c0_i32_1 = arith.constant 0 : i32
    %c0_i32_2 = arith.constant 0 : i32
    return %arg0, %c0_i32, %c0_i32_0, %c0_i32_1 : i32, i32, i32, i32
  }
  func.func @transform_1(%arg0: i32, %arg1: i32) -> (i32, i32, i32) {
    %c0_i32 = arith.constant 0 : i32
    %c0_i32_0 = arith.constant 0 : i32
    %c0_i32_1 = arith.constant 0 : i32
    %c0_i32_2 = arith.constant 0 : i32
    return %c0_i32, %c0_i32_0, %c0_i32_1 : i32, i32, i32
  }
  func.func @transform_2(%arg0: i32, %arg1: i32) -> (i32, i32) {
    %c0_i32 = arith.constant 0 : i32
    %c0_i32_0 = arith.constant 0 : i32
    %c0_i32_1 = arith.constant 0 : i32
    return %c0_i32, %c0_i32_0 : i32, i32
  }
  func.func @transform_3(%arg0: i32, %arg1: i32) -> (i32, i32, i32, i32) {
    %c0_i32 = arith.constant 0 : i32
    %c0_i32_0 = arith.constant 0 : i32
    %c0_i32_1 = arith.constant 0 : i32
    return %arg0, %arg1, %c0_i32, %c0_i32_0 : i32, i32, i32, i32
  }
}

</mosaic_0001>

<bundles_post_ra>
// kernel: basic_conv.1
= control target key start
LH: loop header
LB: loop body
LE: loop exit
PB: predicated region body
PF: predicated region fallthrough
CT: control target
= control target key end

     0   :  { %s4592_s0 = inlined_call_operand.hbm [shape: bf16[2,18,24,128], index: 0, kind: input, shape index: {}]   ;;  %s4593_s1 = inlined_call_operand.hbm [shape: bf16[3,384,128], index: 1, kind: input, shape index: {}]   ;;  %s4594_s2 = inlined_call_operand.hbm [shape: f32[1,128], index: 2, kind: input, shape index: {}]   ;;  %s4595_s3 = inlined_call_operand.hbm [shape: f32[2,16,24,128], index: 3, kind: output, shape index: {}]  }
   0x1   :  { %4607 = sst [smem:[#allocation18_spill]] %s4593_s1 }
   0x2   :  { %4608 = sst [smem:[#allocation19_spill]] %s4594_s2 }
   0x3   :  { %8 = vsyncpa [#allocation5], 0 }
   0x4   :  { %10 = vsyncpa [#allocation5 + $0x1], 0 }
   0x5   :  { %11 = vsyncpa [#allocation8], 0 }
   0x6   :  { %12 = vsyncpa [#allocation6], 0 }
   0x7   :  { %14 = vsyncpa [#allocation6 + $0x1], 0  ;;  %s3675_s12 = smov 0   ;;  %s3677_s13 = smov 0  }
   0x8   :  { %s3679_s14 = smov 0   ;;  %s3681_s15 = smov 0  }
   0x9   :  { %s3683_s16 = smov 0   ;;  %s3685_s17 = smov 0  }
   0xa   :  { %s3687_s18 = smov 0   ;;  %s3689_s19 = smov 0  }
   0xb   :  { %s3691_s20 = smov 0   ;;  %s3693_s21 = smov 0  }
   0xc   :  { %s3695_s22 = smov 0  }
   0xd LB: > { %4609 = sst [smem:[#allocation14_spill]] %s3605_s12  ;;  %s2552_s23 = sadd.s32 4294967295, %s3645_s22   ;;  %s3645_s22 = sphi %s3695_s22, %s20_s22   ;;  %s3641_s21 = sphi %s3693_s21, %s4643_s21   ;;  %s3637_s20 = sphi %s3691_s20, %s4634_s20   ;;  %s3633_s19 = sphi %s3689_s19, %s4642_s19   ;;  %s3629_s18 = sphi %s3687_s18, %s4633_s18   ;;  %s3625_s17 = sphi %s3685_s17, %s4641_s17   ;;  %s3621_s16 = sphi %s3683_s16, %s4640_s16   ;;  %s3617_s15 = sphi %s3681_s15, %s4639_s15   ;;  %s3613_s14 = sphi %s3679_s14, %s4638_s14   ;;  %s3609_s13 = sphi %s3677_s13, %s4637_s13   ;;  %s3605_s12 = sphi %s3675_s12, %s4636_s12  }
   0xe   : > { %4610 = sst [smem:[#allocation15_spill]] %s3637_s20  ;;  %s2553_s24 = sadd.s32 4294967294, %s3645_s22  }
   0xf   : > { %p52_p0 = scmp.ne.s32.totalorder %s3621_s16, %s3617_s15  ;;  %p3731_p1 = scmp.eq.s32.totalorder %s2552_s23, 0 }
  0x10   : > { %p119_p2 = scmp.ne.s32.totalorder %s3613_s14, %s3609_s13  ;;  %p120_p4 = scmp.eq.s32.totalorder %s2552_s23, 3 }
  0x11   : > { %s4611_s25 = scalar_select %p3731_p1, 1, 0 }
  0x12   : > { %p3740_p3 = por %p3731_p1, %p52_p0  ;;  %p125_p5 = scmp.ne.s32.totalorder %s3609_s13, %s3605_s12 }
  0x13   : > { %p126_p6 = scmp.eq.s32.totalorder %s2553_s24, 3  ;;  %p3746_p7 = por %p120_p4, %p119_p2 }
  0x14   : > { %s4612_s27 = scalar_select %p3740_p3, 1, 0 }
  0x15   : > { %s4613_s28 = scalar_select %p3746_p7, 1, 0 }
  0x16   : > { %p2554_p8 = scmp.ge.s32.totalorder %s3645_s22, 1  ;;  %p3751_p9 = por %p126_p6, %p125_p5 }
  0x17   : > { %p133_p10 = scmp.lt.s32.totalorder %s3645_s22, 5  ;;  %s3647_s4 = smov [#allocation7]  }
  0x18   : > { %s4614_s29 = scalar_select %p3751_p9, 1, 0 }
  0x19   : > { %p3756_p11 = pnand %p2554_p8, %p133_p10  ;;  %s145_s5 = sshll.u32 %s3647_s4, 4  ;;  %s146_s5 = int_to_ptr.vmem [resolvable:$true] %s145_s5 }
  0x1a   : > { %4615 = sst [smem:[#allocation16_spill]] %s4614_s29  ;;  %s3648_s7 = smov [#allocation9]  }
  0x1b   : > { %s4616_s30 = scalar_select %p3756_p11, 1, 0 }
  0x1c   : > { %p3210_p12 = pneg %p3756_p11  ;;  %s159_s8 = sshll.u32 %s3648_s7, 4  ;;  %s3768_s8 = int_to_ptr.vmem [resolvable:$true] %s159_s8 }
  0x1d   : > { %s4618_s1 = sld [smem:[#allocation18_spill]] }
  0x1e   : > { %p3764_p13 = pnand %p3210_p12, %p3731_p1 }
  0x20   : > { %p3435_p2 = pneg %p3764_p13 }
  0x23   : > { %s3433_s11 = scalar_lea.hbm %s4618_s1, 9216 }
  0x24   : > { %p3434_p0 = scmp.ne.s32.totalorder %s4618_s1, %s3433_s11  ;;  %p3440_p6 = scmp.lt.u32.totalorder %s3433_s11, %s4618_s1 }
  0x26   : > { %p3436_p4 = pnand %p3435_p2, %p3434_p0 }
  0x28   : > { %p3437_p5 = pneg %p3436_p4 }
  0x2a   : > { %p3442_p8 = pnand %p3440_p6, %p3437_p5 }
  0x2c   : > { %3445 = shalt.err (!%p3442_p8)
}
  0x2d   : > { %s3446_s7 = scalar_lea.vmem %s146_s5, 9216  ;;  %p3454_p7 = scmp.lt.s32.totalorder %s146_s5, %s146_s5 }
  0x2e   : > { %p3447_p10 = scmp.ne.s32.totalorder %s146_s5, %s3446_s7  ;;  %p3455_p1 = scmp.lt.s32.totalorder %s3446_s7, %s3446_s7 }
  0x30   : > { %p3449_p12 = pnand %p3447_p10, %p3435_p2  ;;  %p3456_p3 = por %p3455_p1, %p3454_p7 }
  0x32   : > { %p3450_p9 = pneg %p3449_p12 }
  0x34   : > { %p3457_p11 = pnand %p3456_p3, %p3450_p9 }
  0x36   : > { %3460 = shalt.err (!%p3457_p11)
}
  0x37   : > { %s4603_s9 = smov 64   ;;  %s4604_s10 = smov 4  }
  0x38   : > { %3213 = dma.hbm_to_vmem [thread:$0]  (!%p3764_p13), %s4618_s1, 9216, %s146_s5, [#allocation8], %s4603_s9, %s4603_s9, %s4604_s10  }
  0x39   : > { %s4619_s2 = sld [smem:[#allocation19_spill]] }
  0x3f   : > { %s3461_s4 = scalar_lea.hbm %s4619_s2, 16 }
  0x40   : > { %p3462_p1 = scmp.ne.s32.totalorder %s4619_s2, %s3461_s4  ;;  %p3468_p9 = scmp.lt.u32.totalorder %s3461_s4, %s4619_s2 }
  0x42   : > { %p3464_p3 = pnand %p3462_p1, %p3435_p2 }
  0x44   : > { %p3465_p7 = pneg %p3464_p3 }
  0x46   : > { %p3470_p11 = pnand %p3468_p9, %p3465_p7 }
  0x48   : > { %3473 = shalt.err (!%p3470_p11)
}
  0x49   : > { %s3474_s5 = scalar_lea.vmem %s3768_s8, 16  ;;  %s3481_s26 = scalar_lea.vmem %s3768_s8, 32 }
  0x4a   : > { %p3475_p0 = scmp.ne.s32.totalorder %s3768_s8, %s3474_s5  ;;  %p3482_p6 = scmp.lt.s32.totalorder %s3768_s8, %s3768_s8 }
  0x4b   : > { %p3483_p8 = scmp.lt.s32.totalorder %s3481_s26, %s3474_s5 }
  0x4c   : > { %p3477_p4 = pnand %p3475_p0, %p3435_p2 }
  0x4d   : > { %p3484_p10 = por %p3483_p8, %p3482_p6 }
  0x4e   : > { %p3478_p5 = pneg %p3477_p4 }
  0x50   : > { %p3485_p12 = pnand %p3484_p10, %p3478_p5 }
  0x52   : > { %3488 = shalt.err (!%p3485_p12)
}
  0x53   : > { %3216 = dma.hbm_to_vmem [thread:$0]  (!%p3764_p13), %s4619_s2, 16, %s3768_s8, [#allocation8]  }
  0x54   : > { %s29_s11 = sadd.s32 1, %s3637_s20  ;;  %s32_s15 = sadd.s32 1, %s3641_s21 }
  0x55   : > { %p30_p2 = scmp.ge.s32.totalorder %s29_s11, 2  ;;  %s39_s6 = sadd.s32 1, %s3625_s17 }
  0x56   : > { %p46_p1 = scmp.ne.s32.totalorder %s3625_s17, %s3621_s16  ;;  %p47_p3 = scmp.eq.s32.totalorder %s3645_s22, 0 }
  0x57   : > { %s4645_s11 = smov (%p30_p2, %s29_s11), 0  ;;  %s4647_s15 = smov (!%p30_p2, %s32_s15), %s3641_s21 }
  0x58   : > { %4620 = sst [smem:[#allocation17_spill]] %s4645_s11  ;;  %p3830_p7 = por %p47_p3, %p46_p1 }
  0x59   : > { %s105_s24 = ssub.s32 %s3637_s20, %s4645_s11  ;;  %p34_p13 = scmp.ge.s32.totalorder %s4647_s15, 2 }
  0x5a   : > { %p3227_p9 = scmp.lt.s32.totalorder %s3645_s22, 4  ;;  %s170_s8 = sand.u32 1, %s3625_s17  }
  0x5b   : > { %s3193_s4 = smul.u32 3456, %s3641_s21  ;;  %s4649_s15 = smov (%p34_p13, %s4647_s15), 0 }
  0x5c   : > { %s3192_s7 = smul.u32 216, %s170_s8  ;;  %s36_s5 = ssub.s32 %s3641_s21, %s4649_s15 }
  0x5d   : > { %s3846_s29 = scalar_lea.hbm %s4592_s0, %s3193_s4  ;;  %p37_p11 = scmp.eq.s32.totalorder %s36_s5, 0 }
  0x5e   : > { %s106_s9 = sor.u32 %s105_s24, %s36_s5  ;;  %s4622_s1 = sadd.s32 1, %s3613_s14 }
  0x5f   : > { %p107_p0 = scmp.eq.s32.totalorder %s106_s9, 0  ;;  %s174_s11 = scalar_lea.vmem [#allocation4], %s3192_s7 }
  0x60   : > { %s3849_s10 = scalar_select %p37_p11, %s3625_s17, %s39_s6  }
  0x61   : > { %s3854_s2 = scalar_select %p107_p0, %s3613_s14, %s4622_s1  }
  0x62   : > { %s181_s20 = sshll.u32 %s174_s11, 4  ;;  %p3860_p4 = pnand %p3227_p9, %p3830_p7  ;;  %s3864_s20 = int_to_ptr.vmem [resolvable:$true] %s181_s20 }
  0x63   : > { %s3866_s24 = scalar_lea.sflag [#allocation5], %s170_s8  ;;  %s3489_s9 = scalar_lea.hbm %s3846_s29, 3456 }
  0x64   : > { %p3490_p5 = scmp.ne.s32.totalorder %s3846_s29, %s3489_s9  ;;  %p3491_p6 = pneg %p3860_p4 }
  0x65   : > { %s3494_s6 = scalar_lea.hbm %s4592_s0, 6912  ;;  %p3495_p12 = scmp.lt.u32.totalorder %s3846_s29, %s4592_s0 }
  0x66   : > { %p3492_p8 = pnand %p3491_p6, %p3490_p5  ;;  %p3496_p2 = scmp.lt.u32.totalorder %s3494_s6, %s3489_s9 }
  0x67   : > { %p3498_p3 = scmp.lt.u32.totalorder %s3489_s9, %s3846_s29 }
  0x68   : > { %p3493_p10 = pneg %p3492_p8  ;;  %p3497_p1 = por %p3496_p2, %p3495_p12 }
  0x6a   : > { %p3499_p7 = por %p3498_p3, %p3497_p1 }
  0x6c   : > { %p3500_p13 = pnand %p3499_p7, %p3493_p10 }
  0x6e   : > { %3503 = shalt.err (!%p3500_p13)
}
  0x6f   : > { %s3504_s8 = scalar_lea.vmem %s3864_s20, 3456  ;;  %s3651_s7 = smov [#allocation4]  }
  0x70   : > { %p3505_p9 = scmp.ne.s32.totalorder %s3864_s20, %s3504_s8  ;;  %s3509_s5 = sshll.u32 %s3651_s7, 4  ;;  %s3510_s5 = int_to_ptr.vmem [resolvable:$false] %s3509_s5 }
  0x71   : > { %s3511_s12 = scalar_lea.vmem %s3510_s5, 6912  ;;  %p3512_p5 = scmp.lt.s32.totalorder %s3864_s20, %s3510_s5 }
  0x72   : > { %p3507_p11 = pnand %p3505_p9, %p3491_p6  ;;  %p3513_p8 = scmp.lt.s32.totalorder %s3511_s12, %s3504_s8 }
  0x74   : > { %p3508_p0 = pneg %p3507_p11  ;;  %p3514_p12 = por %p3513_p8, %p3512_p5 }
  0x76   : > { %p3515_p2 = pnand %p3514_p12, %p3508_p0 }
  0x78   : > { %3518 = shalt.err (!%p3515_p2)
}
  0x79   : > { %s4624_s9 = smov 4   ;;  %s4625_s1 = smov 64  }
  0x7a   : > { %3220 = dma.hbm_to_vmem [thread:$0]  (!%p3860_p4), %s3846_s29, 3456, %s3864_s20, %s3866_s24, %s4625_s1, %s4625_s1, %s4624_s9  }
  0x7b   : > { %p4626_p6 = scmp.ne.s32.totalorder %s4616_s30, 0 }
  0x7c   : > { %s195_s11 = sand.u32 (!%p4626_p6), 1, %s3621_s16   ;;  %p4627_p10 = scmp.ne.s32.totalorder (!%p4626_p6), %s4612_s27, 0 }
  0x7d   : > { %193 = sbr.rel (%p4626_p6) target bundleno = 636 (0x27c), region = 32  ;;  %s196_s23 = scalar_lea.sflag (!%p4626_p6), [#allocation5], %s195_s11 }
  0x7e   : > { %s3900_s6 = smul.u32 (!%p4626_p6), 216, %s195_s11 }
  0x80   : > { %s199_s4 = scalar_lea.vmem (!%p4626_p6), [#allocation4], %s3900_s6 }
  0x84   : > { %3592 = dma.done.wait (%p4627_p10), %s196_s23, 3456  }
  0x85   : > { %3594 = vsyncadd (%p4627_p10), %s196_s23, 4294963840  ;;  %p4628_p1 = scmp.ne.s32.totalorder %s4611_s25, 0 }
  0x87   : > { %3596 = dma.done.wait (%p4628_p1), [#allocation8], 9232  }
  0x88   : > { %3598 = vsyncadd (%p4628_p1), [#allocation8], 4294958064  ;;  %v3325_v0 = vld [vmem:[#allocation7 + $0x40] sm:$0xff]   ;;  %v3328_v3 = vld [vmem:[#allocation7 + $0x48] sm:$0xff]   ;;  %s2731_s20 = smul.u32 96, %s3629_s18  ;;  %vm1577_vm0 = vcmask 1046528  }
  0x89   : > { %v3326_v1 = vld [vmem:[#allocation7 + $0x80] sm:$0xff]   ;;  %2732 = vmatprep.subr.bf16.mxu0 %v3325_v0  ;;  %v3329_v4 = vld [vmem:[#allocation7 + $0x88] sm:$0xff]   ;;  %v3331_v6 = vld [vmem:[#allocation7 + $0x50] sm:$0xff]   ;;  %s227_s27 = sand.u32 1, %s3609_s13   ;;  %vm2196_vm1 = vcmask 1045504   ;;  %s3196_s26 = smul.u32 24, %s3629_s18 }
  0x8a   : > { %v3327_v2 = vld [vmem:[#allocation7] sm:$0xff]   ;;  %3056 = vmatprep.subr.bf16.mxu1 %v3326_v1  ;;  %v3330_v5 = vld [vmem:[#allocation7 + $0x8] sm:$0xff]   ;;  %v3332_v7 = vld [vmem:[#allocation7 + $0x90] sm:$0xff]   ;;  %s3914_s25 = scalar_lea.vmem %s199_s4, %s2731_s20 [#allocation4]  ;;  %s4396_s30 = smul.u32 192, %s227_s27 }
  0x8b   : > { %2733 = vmatpush3.bf16.msra.mxu0 %v3327_v2  ;;  %3057 = vmatpush3.bf16.msra.mxu1 %v3326_v1  ;;  %v3333_v8 = vld [vmem:[#allocation7 + $0x10] sm:$0xff]   ;;  %v3334_v9 = vld [vmem:[#allocation7 + $0x58] sm:$0xff]   ;;  %v3337_v12 = vld [vmem:[#allocation7 + $0x60] sm:$0xff]   ;;  %s3197_s24 = smul.u32 48, %s3633_s19  ;;  %s4531_s9 = scalar_lea.sflag [#allocation6], %s227_s27 }
  0x8c   : > { %2734 = vmatprep.subr.bf16.mxu0 %v3328_v3  ;;  %3058 = vmatprep.subr.bf16.mxu1 %v3329_v4  ;;  %v3335_v10 = vld [vmem:[#allocation7 + $0x98] sm:$0xff]   ;;  %v3338_v13 = vld [vmem:[#allocation7 + $0xa0] sm:$0xff]   ;;  %v3340_v15 = vld [vmem:[#allocation7 + $0x68] sm:$0xff]   ;;  %s4418_s29 = scalar_lea.vmem [#allocation10], %s4396_s30  ;;  %p4629_p3 = scmp.ne.s32.totalorder %s4613_s28, 0 }
  0x8d   : > { %v3336_v11 = vld [vmem:[#allocation7 + $0x18] sm:$0xff]   ;;  %v3339_v14 = vld [vmem:[#allocation7 + $0x20] sm:$0xff]   ;;  %v3341_v16 = vld [vmem:[#allocation7 + $0xa8] sm:$0xff]   ;;  %s2433_s8 = sadd.s32 %s3197_s24, %s3196_s26  ;;  %s2436_s7 = sshll.u32 %s4418_s29, 4  ;;  %s4521_s7 = int_to_ptr.vmem [resolvable:$true] %s2436_s7 }
  0x8e   : > { %v3342_v17 = vld [vmem:[#allocation7 + $0x28] sm:$0xff]   ;;  %v3343_v18 = vld [vmem:[#allocation7 + $0x70] sm:$0xff]   ;;  %v3346_v21 = vld [vmem:[#allocation7 + $0x78] sm:$0xff]   ;;  %s2728_s5 = sshll.u32 %s2433_s8, 7  ;;  %s3519_s1 = scalar_lea.vmem %s4521_s7, 3072 }
  0x8f   : > { %2735 = vmatpush3.bf16.msra.mxu0 %v3330_v5  ;;  %3059 = vmatpush3.bf16.msra.mxu1 %v3329_v4  ;;  %v3344_v19 = vld [vmem:[#allocation7 + $0xb0] sm:$0xff]   ;;  %v3347_v22 = vld [vmem:[#allocation7 + $0xb8] sm:$0xff]   ;;  %v3920_v24 = vld [vmem:[%s3914_s25 + $0x18] sm:$0xff]   ;;  %s4526_s12 = scalar_lea.hbm %s4595_s3, %s2728_s5  ;;  %p3520_p4 = scmp.ne.s32.totalorder %s4521_s7, %s3519_s1 }
  0x90   : > { %2736 = vmatprep.subr.bf16.mxu0 %v3331_v6  ;;  %3060 = vmatprep.subr.bf16.mxu1 %v3332_v7  ;;  %v3345_v20 = vld [vmem:[#allocation7 + $0x30] sm:$0xff]   ;;  %v3917_v23 = vld [vmem:[%s3914_s25 + $0xc] sm:$0xff]   ;;  %v3933_v31 = vld [vmem:[%s3914_s25 + $0x14] sm:$0xff]   ;;  %s3652_s11 = smov [#allocation10]  }
  0x91   : > { %828 = vmatprep.mubr.bf16.mxu0 %v3917_v23  ;;  %v3348_v25 = vld [vmem:[#allocation7 + $0x38] sm:$0xff]   ;;  %3072 = vmatprep.mubr.bf16.mxu1 %v3920_v24  ;;  %v3924_v26 = vld [vmem:[#allocation7 + $0x140] sm:$0xff]   ;;  %v3927_v27 = vld [vmem:[%s3914_s25] sm:$0xff]   ;;  %p3521_p7 = pnand %p3520_p4, %p4629_p3  ;;  %s3523_s6 = sshll.u32 %s3652_s11, 4  ;;  %s3524_s6 = int_to_ptr.vmem [resolvable:$false] %s3523_s6 }
  0x92   : > { %v3354_v28 = vld [vmem:[#allocation7 + $0x100] sm:$0xff]   ;;  %v3930_v29 = vld [vmem:[%s3914_s25 + $0x20] sm:$0xff]   ;;  %v3937_v32 = vld [vmem:[%s3914_s25 + $0x28] sm:$0xff]   ;;  %s3525_s23 = scalar_lea.vmem %s3524_s6, 6144  ;;  %p3526_p9 = scmp.lt.s32.totalorder %s4521_s7, %s3524_s6 }
  0x93   : > { %2737 = vmatpush3.bf16.msra.mxu0 %v3333_v8  ;;  %3061 = vmatpush3.bf16.msra.mxu1 %v3332_v7  ;;  %v3355_v30 = vld [vmem:[#allocation7 + $0xc0] sm:$0xff]   ;;  %v3360_v33 = vld [vmem:[#allocation7 + $0x108] sm:$0xff]   ;;  %v3945_v35 = vld [vmem:[%s3914_s25 + $0x8] sm:$0xff]   ;;  %p3522_p13 = pneg %p3521_p7  ;;  %p3527_p11 = scmp.lt.s32.totalorder %s3525_s23, %s3519_s1 }
  0x94   : > { %2738 = vmatprep.subr.bf16.mxu0 %v3334_v9  ;;  %3062 = vmatprep.subr.bf16.mxu1 %v3335_v10  ;;  %v3361_v34 = vld [vmem:[#allocation7 + $0xc8] sm:$0xff]   ;;  %v3948_v36 = vld [vmem:[%s3914_s25 + $0x30] sm:$0xff]   ;;  %v3365_v40 = vld [vmem:[#allocation7 + $0x110] sm:$0xff]  }
  0x95   : > { %v3950_v37 = vld [vmem:[#allocation7 + $0x148] sm:$0xff]   ;;  %v3368_v41 = vld [vmem:[#allocation7 + $0xd0] sm:$0xff]   ;;  %v3369_v42 = vld [vmem:[#allocation7 + $0x118] sm:$0xff]   ;;  %p3528_p0 = por %p3527_p11, %p3526_p9 }
  0x96   : > { %v3953_v38 = vld [vmem:[%s3914_s25 + $0x1c] sm:$0xff]   ;;  %v3965_v43 = vld [vmem:[%s3914_s25 + $0x10] sm:$0xff]   ;;  %v3370_v44 = vld [vmem:[#allocation7 + $0xd8] sm:$0xff]  }
  0x97   : > { %2739 = vmatpush3.bf16.msra.mxu0 %v3336_v11  ;;  %3063 = vmatpush3.bf16.msra.mxu1 %v3335_v10  ;;  %v3957_v39 = vld [vmem:[%s3914_s25 + $0x38] sm:$0xff]   ;;  %v3968_v45 = vld [vmem:[%s3914_s25 + $0x40] sm:$0xff]   ;;  %v3974_v47 = vld [vmem:[%s3914_s25 + $0x48] sm:$0xff]   ;;  %p3529_p5 = pnand %p3528_p0, %p3522_p13 }
  0x98   : > { %2740 = vmatprep.subr.bf16.mxu0 %v3337_v12  ;;  %3064 = vmatprep.subr.bf16.mxu1 %v3338_v13  ;;  %v3971_v46 = vld [vmem:[%s3914_s25 + $0x24] sm:$0xff]   ;;  %v3376_v49 = vld [vmem:[#allocation7 + $0x120] sm:$0xff]   ;;  %v3983_v51 = vld [vmem:[%s3914_s25 + $0x18] sm:$0xff]  }
  0x99   : > { %v3976_v48 = vld [vmem:[#allocation7 + $0x150] sm:$0xff]   ;;  %v3377_v50 = vld [vmem:[#allocation7 + $0xe0] sm:$0xff]   ;;  %v3994_v54 = vld [vmem:[%s3914_s25 + $0x58] sm:$0xff]  }
  0x9a   : > { %v3987_v52 = vld [vmem:[%s3914_s25 + $0x50] sm:$0xff]   ;;  %v3382_v55 = vld [vmem:[#allocation7 + $0x128] sm:$0xff]   ;;  %v3998_v57 = vld [vmem:[#allocation7 + $0x158] sm:$0xff]  }
  0x9b   : > { %2741 = vmatpush3.bf16.msra.mxu0 %v3339_v14  ;;  %3065 = vmatpush3.bf16.msra.mxu1 %v3338_v13  ;;  %v3991_v53 = vld [vmem:[%s3914_s25 + $0x2c] sm:$0xff]   ;;  %v3383_v56 = vld [vmem:[#allocation7 + $0xe8] sm:$0xff]   ;;  %v4003_v58 = vld [vmem:[%s3914_s25 + $0x20] sm:$0xff]  }
  0x9c   : > { %2742 = vmatprep.subr.bf16.mxu0 %v3340_v15  ;;  %3066 = vmatprep.subr.bf16.mxu1 %v3341_v16  ;;  %v4006_v59 = vld [vmem:[%s3914_s25 + $0x60] sm:$0xff]   ;;  %v4011_v61 = vld [vmem:[%s3914_s25 + $0x34] sm:$0xff]   ;;  %v4014_v62 = vld [vmem:[%s3914_s25 + $0x68] sm:$0xff]  }
  0x9d   : > { %v3387_v60 = vld [vmem:[#allocation7 + $0x130] sm:$0xff]   ;;  %v3391_v0 = vld [vmem:[#allocation7 + $0x138] sm:$0xff]   ;;  %v3395_v3 = vld [vmem:[#allocation7 + $0x160] sm:$0xff]  }
  0x9e   : > { %v3390_v63 = vld [vmem:[#allocation7 + $0xf0] sm:$0xff]   ;;  %v4021_v1 = vld [vmem:[%s3914_s25 + $0x28] sm:$0xff]   ;;  %v4024_v4 = vld [vmem:[%s3914_s25 + $0x70] sm:$0xff]  }
  0x9f   : > { %2743 = vmatpush3.bf16.msra.mxu0 %v3342_v17  ;;  %3067 = vmatpush3.bf16.msra.mxu1 %v3341_v16  ;;  %v3392_v2 = vld [vmem:[#allocation7 + $0xf8] sm:$0xff]   ;;  %v4027_v5 = vld [vmem:[%s3914_s25 + $0x3c] sm:$0xff]   ;;  %v4035_v8 = vld [vmem:[%s3914_s25 + $0x30] sm:$0xff]  }
  0xa0   : > { %2744 = vmatprep.subr.bf16.mxu0 %v3343_v18  ;;  %3068 = vmatprep.subr.bf16.mxu1 %v3344_v19  ;;  %v3398_v6 = vld [vmem:[#allocation7 + $0x168] sm:$0xff]   ;;  %v3403_v7 = vld [vmem:[#allocation7 + $0x170] sm:$0xff]   ;;  %v3406_v10 = vld [vmem:[#allocation7 + $0x178] sm:$0xff]  }
  0xa1   : > { %v4038_v9 = vld [vmem:[%s3914_s25 + $0x44] sm:$0xff]   ;;  %v3409_v11 = vld [vmem:[#allocation7 + $0x1c0] sm:$0xff]   ;;  %v4047_v12 = vld [vmem:[%s3914_s25 + $0x38] sm:$0xff]  }
  0xa2   : > { %v4050_v13 = vld [vmem:[%s3914_s25 + $0x4c] sm:$0xff]   ;;  %v4061_v14 = vld [vmem:[%s3914_s25 + $0x40] sm:$0xff]   ;;  %v4064_v15 = vld [vmem:[%s3914_s25 + $0x54] sm:$0xff]  }
  0xa3   : > { %2745 = vmatpush3.bf16.msra.mxu0 %v3345_v20  ;;  %3069 = vmatpush3.bf16.msra.mxu1 %v3344_v19  ;;  %v4072_v16 = vld [vmem:[%s3914_s25 + $0x48] sm:$0xff]   ;;  %v4075_v17 = vld [vmem:[%s3914_s25 + $0x5c] sm:$0xff]   ;;  %v4081_v18 = vld [vmem:[#allocation7 + $0x200] sm:$0xff]  }
  0xa4   : > { %2746 = vmatprep.subr.bf16.mxu0 %v3346_v21  ;;  %3070 = vmatprep.subr.bf16.mxu1 %v3347_v22  ;;  %v4084_v19 = vld [vmem:[%s3914_s25 + $0x50] sm:$0xff]   ;;  %v4087_v20 = vld [vmem:[%s3914_s25 + $0x64] sm:$0xff]   ;;  %v4095_v21 = vld [vmem:[%s3914_s25 + $0x58] sm:$0xff]  }
  0xa7   : > { %2747 = vmatpush3.bf16.msra.mxu0 %v3348_v25  ;;  %3071 = vmatpush3.bf16.msra.mxu1 %v3347_v22  ;;  %v3410_v22 = vld [vmem:[#allocation7 + $0x180] sm:$0xff]   ;;  %v3411_v25 = vld [vmem:[#allocation7 + $0x1c8] sm:$0xff]  }
  0xa8   : > { %3096 = vmatprep.subr.bf16.mxu0 %v3924_v26  ;;  %2840 = vmatprep.subr.bf16.mxu1 %v3354_v28  ;;  %v3413_v28 = vld [vmem:[#allocation7 + $0x1d0] sm:$0xff]  }
  0xaa   : > { %829 = vmatmul.mubr.bf16.vlgmr.msra.gmra.mrb[0].mxu0 %v3927_v27  ;;  %3073 = vmatmul.mubr.bf16.vlgmr.msra.gmra.mrb[0].mxu1 %v3930_v29 }
  0xab   : > { %3097 = vmatpush3.bf16.msra.mxu0 %v3924_v26  ;;  %2841 = vmatpush3.bf16.msra.mxu1 %v3355_v30  ;;  %v3414_v30 = vld [vmem:[#allocation7 + $0x190] sm:$0xff]  }
  0xac   : > { %836 = vmatprep.mubr.bf16.mxu0 %v3933_v31  ;;  %3076 = vmatprep.mubr.bf16.mxu1 %v3937_v32 }
  0xad   : > { %2842 = vmatprep.subr.bf16.mxu1 %v3360_v33  ;;  %3098 = vmatprep.subr.bf16.mxu0 %v3950_v37  ;;  %v3415_v33 = vld [vmem:[#allocation7 + $0x1d8] sm:$0xff]  }
  0xaf   : > { %2843 = vmatpush3.bf16.msra.mxu1 %v3361_v34  ;;  %3099 = vmatpush3.bf16.msra.mxu0 %v3950_v37  ;;  %v3416_v34 = vld [vmem:[#allocation7 + $0x198] sm:$0xff]  }
  0xb0   : > { %2844 = vmatprep.subr.bf16.mxu1 %v3365_v40  ;;  %3100 = vmatprep.subr.bf16.mxu0 %v3976_v48  ;;  %v3418_v40 = vld [vmem:[#allocation7 + $0x1a0] sm:$0xff]  }
  0xb2   : > { %837 = vmatmul.mubr.bf16.gmra.mrb[4].mxu0 %v3945_v35  ;;  %3077 = vmatmul.mubr.bf16.gmra.mrb[4].mxu1 %v3948_v36 }
  0xb3   : > { %844 = vmatprep.mubr.bf16.mxu0 %v3953_v38  ;;  %3080 = vmatprep.mubr.bf16.mxu1 %v3957_v39 }
  0xb4   : > { %2845 = vmatpush3.bf16.msra.mxu1 %v3368_v41  ;;  %3101 = vmatpush3.bf16.msra.mxu0 %v3976_v48  ;;  %v3419_v41 = vld [vmem:[#allocation7 + $0x1e8] sm:$0xff]  }
  0xb5   : > { %2846 = vmatprep.subr.bf16.mxu1 %v3369_v42  ;;  %3102 = vmatprep.subr.bf16.mxu0 %v3998_v57  ;;  %v3420_v42 = vld [vmem:[#allocation7 + $0x1a8] sm:$0xff]  }
  0xb8   : > { %2847 = vmatpush3.bf16.msra.mxu1 %v3370_v44  ;;  %3103 = vmatpush3.bf16.msra.mxu0 %v3998_v57  ;;  %v3421_v44 = vld [vmem:[#allocation7 + $0x1f0] sm:$0xff]  }
  0xb9   : > { %2848 = vmatprep.subr.bf16.mxu1 %v3376_v49  ;;  %3104 = vmatprep.subr.bf16.mxu0 %v3395_v3  ;;  %v3423_v49 = vld [vmem:[#allocation7 + $0x1f8] sm:$0xff]  }
  0xba   : > { %845 = vmatmul.mubr.bf16.gmra.mrb[8].mxu0 %v3965_v43  ;;  %3081 = vmatmul.mubr.bf16.gmra.mrb[8].mxu1 %v3968_v45 }
  0xbb   : > { %852 = vmatprep.mubr.bf16.mxu0 %v3971_v46  ;;  %3084 = vmatprep.mubr.bf16.mxu1 %v3974_v47 }
  0xbc   : > { %2849 = vmatpush3.bf16.msra.mxu1 %v3377_v50  ;;  %3105 = vmatpush3.bf16.msra.mxu0 %v3395_v3  ;;  %v3424_v50 = vld [vmem:[#allocation7 + $0x1b8] sm:$0xff]  }
  0xbd   : > { %2850 = vmatprep.subr.bf16.mxu1 %v3382_v55  ;;  %3106 = vmatprep.subr.bf16.mxu0 %v3398_v6  ;;  %v3426_v55 = vld [vmem:[#allocation7 + $0x208] sm:$0xff]  }
  0xc0   : > { %2851 = vmatpush3.bf16.msra.mxu1 %v3383_v56  ;;  %3107 = vmatpush3.bf16.msra.mxu0 %v3398_v6 }
  0xc1   : > { %2852 = vmatprep.subr.bf16.mxu1 %v3387_v60  ;;  %3108 = vmatprep.subr.bf16.mxu0 %v3403_v7 }
  0xc2   : > { %853 = vmatmul.mubr.bf16.gmra.mrb[12].mxu0 %v3983_v51  ;;  %3085 = vmatmul.mubr.bf16.gmra.mrb[12].mxu1 %v3987_v52 }
  0xc3   : > { %860 = vmatprep.mubr.bf16.mxu0 %v3991_v53  ;;  %3088 = vmatprep.mubr.bf16.mxu1 %v3994_v54 }
  0xc4   : > { %2853 = vmatpush3.bf16.msra.mxu1 %v3390_v63  ;;  %3109 = vmatpush3.bf16.msra.mxu0 %v3403_v7 }
  0xc5   : > { %2854 = vmatprep.subr.bf16.mxu1 %v3391_v0  ;;  %3110 = vmatprep.subr.bf16.mxu0 %v3406_v10 }
  0xc8   : > { %2855 = vmatpush3.bf16.msra.mxu1 %v3392_v2  ;;  %3111 = vmatpush3.bf16.msra.mxu0 %v3406_v10 }
  0xc9   : > { %3176 = vmatprep.subr.bf16.mxu1 %v3924_v26  ;;  %2948 = vmatprep.subr.bf16.mxu0 %v3409_v11 }
  0xca   : > { %861 = vmatmul.mubr.bf16.gmra.mrb[16].mxu0 %v4003_v58  ;;  %3089 = vmatmul.mubr.bf16.gmra.mrb[16].mxu1 %v4006_v59 }
  0xcb   : > { %868 = vmatprep.mubr.bf16.mxu0 %v4011_v61  ;;  %3092 = vmatprep.mubr.bf16.mxu1 %v4014_v62 }
  0xd2   : > { %869 = vmatmul.mubr.bf16.gmra.mrb[20].mxu0 %v4021_v1  ;;  %3093 = vmatmul.mubr.bf16.gmra.mrb[20].mxu1 %v4024_v4 }
  0xd3   : > { %876 = vmatprep.mubr.bf16.mxu0 %v4027_v5  ;;  %1303 = vmatprep.mubr.bf16.mxu1 %v3917_v23 }
  0xda   : > { %877 = vmatmul.mubr.bf16.gmra.mrb[24].mxu0 %v4035_v8  ;;  %1304 = vmatmul.mubr.bf16.vlgmr.msra.gmra.mrb[24].mxu1 %v3927_v27 }
  0xdb   : > { %3184 = vmatpush3.bf16.msra.mxu1 %v3924_v26  ;;  %884 = vmatprep.mubr.bf16.mxu0 %v4038_v9  ;;  %v3412_v26 = vld [vmem:[#allocation7 + $0x188] sm:$0xff]  }
  0xdc   : > { %1311 = vmatprep.mubr.bf16.mxu1 %v3933_v31  ;;  %3177 = vmatprep.subr.bf16.mxu1 %v3950_v37 }
  0xdf   : > { %3185 = vmatpush3.bf16.msra.mxu1 %v3950_v37  ;;  %v3417_v37 = vld [vmem:[#allocation7 + $0x1e0] sm:$0xff]  }
  0xe0   : > { %3178 = vmatprep.subr.bf16.mxu1 %v3976_v48 }
  0xe2   : > { %885 = vmatmul.mubr.bf16.gmra.mrb[28].mxu0 %v4047_v12  ;;  %1312 = vmatmul.mubr.bf16.gmra.mrb[28].mxu1 %v3945_v35 }
  0xe3   : > { %892 = vmatprep.mubr.bf16.mxu0 %v4050_v13  ;;  %1319 = vmatprep.mubr.bf16.mxu1 %v3953_v38 }
  0xe4   : > { %3186 = vmatpush3.bf16.msra.mxu1 %v3976_v48  ;;  %v3422_v48 = vld [vmem:[#allocation7 + $0x1b0] sm:$0xff]  }
  0xe5   : > { %3179 = vmatprep.subr.bf16.mxu1 %v3998_v57 }
  0xe8   : > { %3187 = vmatpush3.bf16.msra.mxu1 %v3998_v57 }
  0xe9   : > { %3180 = vmatprep.subr.bf16.mxu1 %v3395_v3 }
  0xea   : > { %893 = vmatmul.mubr.bf16.gmra.mrb[32].mxu0 %v4061_v14  ;;  %1320 = vmatmul.mubr.bf16.gmra.mrb[32].mxu1 %v3965_v43 }
  0xeb   : > { %900 = vmatprep.mubr.bf16.mxu0 %v4064_v15  ;;  %1327 = vmatprep.mubr.bf16.mxu1 %v3971_v46 }
  0xec   : > { %3188 = vmatpush3.bf16.msra.mxu1 %v3395_v3 }
  0xed   : > { %3181 = vmatprep.subr.bf16.mxu1 %v3398_v6 }
  0xf0   : > { %3189 = vmatpush3.bf16.msra.mxu1 %v3398_v6 }
  0xf1   : > { %3182 = vmatprep.subr.bf16.mxu1 %v3403_v7 }
  0xf2   : > { %901 = vmatmul.mubr.bf16.gmra.mrb[36].mxu0 %v4072_v16  ;;  %1328 = vmatmul.mubr.bf16.gmra.mrb[36].mxu1 %v3983_v51 }
  0xf3   : > { %908 = vmatprep.mubr.bf16.mxu0 %v4075_v17  ;;  %1335 = vmatprep.mubr.bf16.mxu1 %v3991_v53 }
  0xf4   : > { %3190 = vmatpush3.bf16.msra.mxu1 %v3403_v7 }
  0xf5   : > { %3183 = vmatprep.subr.bf16.mxu1 %v3406_v10 }
  0xf8   : > { %3191 = vmatpush3.bf16.msra.mxu1 %v3406_v10 }
  0xf9   : > { %3136 = vmatprep.subr.bf16.mxu1 %v4081_v18 }
  0xfa   : > { %909 = vmatmul.mubr.bf16.gmra.mrb[40].mxu0 %v4084_v19  ;;  %1336 = vmatmul.mubr.bf16.gmra.mrb[40].mxu1 %v4003_v58 }
  0xfb   : > { %916 = vmatprep.mubr.bf16.mxu0 %v4087_v20  ;;  %1343 = vmatprep.mubr.bf16.mxu1 %v4011_v61 }
 0x102   : > { %917 = vmatmul.mubr.bf16.gmra.mrb[44].mxu0 %v4095_v21  ;;  %1344 = vmatmul.mubr.bf16.gmra.mrb[44].mxu1 %v4021_v1 }
 0x103   : > { %1351 = vmatprep.mubr.bf16.mxu1 %v4027_v5  ;;  %3112 = vmatprep.mubr.bf16.mxu0 %v3920_v24 }
 0x10a   : > { %1352 = vmatmul.mubr.bf16.gmra.mrb[48].mxu1 %v4035_v8  ;;  %3113 = vmatmul.mubr.bf16.vlgmr.msra.gmra.mrb[48].mxu0 %v3930_v29 }
 0x10b   : > { %2949 = vmatpush3.bf16.msra.mxu0 %v3410_v22  ;;  %1359 = vmatprep.mubr.bf16.mxu1 %v4038_v9 }
 0x10c   : > { %2950 = vmatprep.subr.bf16.mxu0 %v3411_v25  ;;  %3116 = vmatprep.mubr.bf16.mxu0 %v3937_v32 }
 0x10f   : > { %2951 = vmatpush3.bf16.msra.mxu0 %v3412_v26 }
 0x110   : > { %2952 = vmatprep.subr.bf16.mxu0 %v3413_v28 }
 0x112   : > { %1360 = vmatmul.mubr.bf16.gmra.mrb[52].mxu1 %v4047_v12  ;;  %3117 = vmatmul.mubr.bf16.gmra.mrb[52].mxu0 %v3948_v36 }
 0x113   : > { %2953 = vmatpush3.bf16.msra.mxu0 %v3414_v30  ;;  %1367 = vmatprep.mubr.bf16.mxu1 %v4050_v13 }
 0x114   : > { %2954 = vmatprep.subr.bf16.mxu0 %v3415_v33  ;;  %3120 = vmatprep.mubr.bf16.mxu0 %v3957_v39 }
 0x117   : > { %2955 = vmatpush3.bf16.msra.mxu0 %v3416_v34 }
 0x118   : > { %2956 = vmatprep.subr.bf16.mxu0 %v3417_v37 }
 0x11a   : > { %1368 = vmatmul.mubr.bf16.gmra.mrb[56].mxu1 %v4061_v14  ;;  %3121 = vmatmul.mubr.bf16.gmra.mrb[56].mxu0 %v3968_v45 }
 0x11b   : > { %2957 = vmatpush3.bf16.msra.mxu0 %v3418_v40  ;;  %1375 = vmatprep.mubr.bf16.mxu1 %v4064_v15 }
 0x11c   : > { %2958 = vmatprep.subr.bf16.mxu0 %v3419_v41  ;;  %3124 = vmatprep.mubr.bf16.mxu0 %v3974_v47 }
 0x11f   : > { %2959 = vmatpush3.bf16.msra.mxu0 %v3420_v42 }
 0x120   : > { %2960 = vmatprep.subr.bf16.mxu0 %v3421_v44 }
 0x122   : > { %1376 = vmatmul.mubr.bf16.gmra.mrb[60].mxu1 %v4072_v16  ;;  %3125 = vmatmul.mubr.bf16.gmra.mrb[60].mxu0 %v3987_v52 }
 0x123   : > { %2961 = vmatpush3.bf16.msra.mxu0 %v3422_v48  ;;  %1383 = vmatprep.mubr.bf16.mxu1 %v4075_v17 }
 0x124   : > { %2962 = vmatprep.subr.bf16.mxu0 %v3423_v49  ;;  %1922 = vmatprep.mubr.bf16.mxu0 %v3917_v23  ;;  %v3427_v23 = vld [vmem:[#allocation7 + $0x210] sm:$0xff]  }
 0x127   : > { %2963 = vmatpush3.bf16.msra.mxu0 %v3424_v50 }
 0x12a   : > { %1384 = vmatmul.mubr.bf16.gmra.mrb[64].mxu1 %v4084_v19  ;;  %1923 = vmatmul.mubr.bf16.vlgmr.msra.gmra.mrb[64].mxu0 %v3927_v27  ;;  %v3428_v27 = vld [vmem:[#allocation7 + $0x218] sm:$0xff]  }
 0x12b   : > { %1391 = vmatprep.mubr.bf16.mxu1 %v4087_v20  ;;  %1930 = vmatprep.mubr.bf16.mxu0 %v3933_v31  ;;  %v3429_v31 = vld [vmem:[#allocation7 + $0x220] sm:$0xff]  }
 0x132   : > { %1392 = vmatmul.mubr.bf16.gmra.mrb[68].mxu1 %v4095_v21  ;;  %1931 = vmatmul.mubr.bf16.gmra.mrb[68].mxu0 %v3945_v35  ;;  %v3430_v35 = vld [vmem:[#allocation7 + $0x228] sm:$0xff]  }
 0x133   : > { %3128 = vmatprep.mubr.bf16.mxu1 %v3994_v54  ;;  %1938 = vmatprep.mubr.bf16.mxu0 %v3953_v38  ;;  %v3431_v38 = vld [vmem:[#allocation7 + $0x230] sm:$0xff]  }
 0x13a   : > { %3129 = vmatmul.mubr.bf16.vlgmr.msra.gmra.mrb[72].mxu1 %v4006_v59  ;;  %1939 = vmatmul.mubr.bf16.gmra.mrb[72].mxu0 %v3965_v43  ;;  %v3432_v43 = vld [vmem:[#allocation7 + $0x238] sm:$0xff]  }
 0x13b   : > { %3137 = vmatpush3.bf16.msra.mxu1 %v4081_v18  ;;  %3132 = vmatprep.mubr.bf16.mxu1 %v4014_v62 }
 0x13c   : > { %3138 = vmatprep.subr.bf16.mxu1 %v3426_v55  ;;  %1946 = vmatprep.mubr.bf16.mxu0 %v3971_v46 }
 0x13f   : > { %3139 = vmatpush3.bf16.msra.mxu1 %v3426_v55 }
 0x140   : > { %3140 = vmatprep.subr.bf16.mxu1 %v3427_v23 }
 0x142   : > { %3133 = vmatmul.mubr.bf16.gmra.mrb[76].mxu1 %v4024_v4  ;;  %1947 = vmatmul.mubr.bf16.gmra.mrb[76].mxu0 %v3983_v51 }
 0x143   : > { %3141 = vmatpush3.bf16.msra.mxu1 %v3427_v23  ;;  %1954 = vmatprep.mubr.bf16.mxu0 %v3991_v53 }
 0x144   : > { %3142 = vmatprep.subr.bf16.mxu1 %v3428_v27  ;;  %3152 = vmatprep.mubr.bf16.mxu1 %v3920_v24 }
 0x147   : > { %3143 = vmatpush3.bf16.msra.mxu1 %v3428_v27 }
 0x148   : > { %3144 = vmatprep.subr.bf16.mxu1 %v3429_v31 }
 0x14a   : > { %1955 = vmatmul.mubr.bf16.gmra.mrb[80].mxu0 %v4003_v58 }
 0x14b   : > { %3145 = vmatpush3.bf16.msra.mxu1 %v3429_v31  ;;  %1962 = vmatprep.mubr.bf16.mxu0 %v4011_v61 }
 0x14c   : > { %3146 = vmatprep.subr.bf16.mxu1 %v3430_v35 }
 0x14f   : > { %3147 = vmatpush3.bf16.msra.mxu1 %v3430_v35 }
 0x150   : > { %3148 = vmatprep.subr.bf16.mxu1 %v3431_v38 }
 0x152   : > { %1963 = vmatmul.mubr.bf16.gmra.mrb[84].mxu0 %v4021_v1 }
 0x153   : > { %3149 = vmatpush3.bf16.msra.mxu1 %v3431_v38  ;;  %1970 = vmatprep.mubr.bf16.mxu0 %v4027_v5 }
 0x154   : > { %3150 = vmatprep.subr.bf16.mxu1 %v3432_v43 }
 0x157   : > { %3151 = vmatpush3.bf16.msra.mxu1 %v3432_v43 }
 0x15a   : > { %3153 = vmatmul.mubr.bf16.vlgmr.msra.gmra.mrb[80].mxu1 %v3930_v29  ;;  %1971 = vmatmul.mubr.bf16.gmra.mrb[88].mxu0 %v4035_v8 }
 0x15b   : > { %3156 = vmatprep.mubr.bf16.mxu1 %v3937_v32  ;;  %1978 = vmatprep.mubr.bf16.mxu0 %v4038_v9 }
 0x162   : > { %3157 = vmatmul.mubr.bf16.gmra.mrb[84].mxu1 %v3948_v36  ;;  %1979 = vmatmul.mubr.bf16.gmra.mrb[92].mxu0 %v4047_v12 }
 0x163   : > { %3160 = vmatprep.mubr.bf16.mxu1 %v3957_v39  ;;  %1986 = vmatprep.mubr.bf16.mxu0 %v4050_v13 }
 0x16a   : > { %3161 = vmatmul.mubr.bf16.gmra.mrb[88].mxu1 %v3968_v45  ;;  %1987 = vmatmul.mubr.bf16.gmra.mrb[96].mxu0 %v4061_v14 }
 0x16b   : > { %3164 = vmatprep.mubr.bf16.mxu1 %v3974_v47  ;;  %1994 = vmatprep.mubr.bf16.mxu0 %v4064_v15 }
 0x172   : > { %3165 = vmatmul.mubr.bf16.gmra.mrb[92].mxu1 %v3987_v52  ;;  %1995 = vmatmul.mubr.bf16.gmra.mrb[100].mxu0 %v4072_v16 }
 0x173   : > { %3168 = vmatprep.mubr.bf16.mxu1 %v3994_v54  ;;  %2002 = vmatprep.mubr.bf16.mxu0 %v4075_v17 }
 0x17a   : > { %3169 = vmatmul.mubr.bf16.gmra.mrb[96].mxu1 %v4006_v59  ;;  %2003 = vmatmul.mubr.bf16.gmra.mrb[104].mxu0 %v4084_v19 }
 0x17b   : > { %3172 = vmatprep.mubr.bf16.mxu1 %v4014_v62  ;;  %2010 = vmatprep.mubr.bf16.mxu0 %v4087_v20 }
 0x17d   : > { %v2748_v24 = vpop.f32.mrb[0].mxu0  ;;  %v3074_v29 = vpop.f32.mrb[0].mxu1 }
 0x17e   : > { %v2749_v32 = vpop.f32.mrb[1].mxu0  ;;  %v959_v36 = vpop.f32.mrb[1].mxu1 }
 0x17f   : > { %v2750_v39 = vadd.f32 %v2749_v32, %v2748_v24  ;;  %v2751_v45 = vpop.f32.mrb[2].mxu0  ;;  %v3075_v46 = vpop.f32.mrb[2].mxu1 }
 0x180   : > { %v2752_v47 = vpop.f32.mrb[3].mxu0  ;;  %v962_v51 = vpop.f32.mrb[3].mxu1 }
 0x181   : > { %v4158_v52 = vadd.f32 %v2750_v39, %v959_v36  ;;  %v2753_v53 = vadd.f32 %v2752_v47, %v2751_v45 }
 0x182   : > { %3173 = vmatmul.mubr.bf16.gmra.mrb[100].mxu1 %v4024_v4  ;;  %2011 = vmatmul.mubr.bf16.gmra.mrb[108].mxu0 %v4095_v21 }
 0x183   : > { %v4162_v54 = vadd.f32 %v2753_v53, %v962_v51 }
 0x185   : > { %v2754_v56 = vpop.f32.mrb[4].mxu0  ;;  %v3078_v57 = vpop.f32.mrb[4].mxu1 }
 0x186   : > { %v2755_v58 = vpop.f32.mrb[5].mxu0  ;;  %v975_v59 = vpop.f32.mrb[5].mxu1 }
 0x187   : > { %v2756_v60 = vadd.f32 %v2755_v58, %v2754_v56  ;;  %v2757_v61 = vpop.f32.mrb[6].mxu0  ;;  %v3079_v62 = vpop.f32.mrb[6].mxu1 }
 0x188   : > { %v2758_v63 = vpop.f32.mrb[7].mxu0  ;;  %v978_v0 = vpop.f32.mrb[7].mxu1 }
 0x189   : > { %v4164_v1 = vadd.f32 %v3074_v29, %v2756_v60  ;;  %v2759_v2 = vadd.f32 %v2758_v63, %v2757_v61 }
 0x18b   : > { %v4166_v3 = vadd.f32 %v3075_v46, %v2759_v2 }
 0x18d   : > { %v2760_v5 = vpop.f32.mrb[8].mxu0  ;;  %v3082_v4 = vpop.f32.mrb[8].mxu1 }
 0x18e   : > { %v2761_v6 = vpop.f32.mrb[9].mxu0  ;;  %v991_v7 = vpop.f32.mrb[9].mxu1 }
 0x18f   : > { %v2762_v8 = vadd.f32 %v2761_v6, %v2760_v5  ;;  %v2763_v9 = vpop.f32.mrb[10].mxu0  ;;  %v3083_v10 = vpop.f32.mrb[10].mxu1 }
 0x190   : > { %v2764_v11 = vpop.f32.mrb[11].mxu0  ;;  %v994_v12 = vpop.f32.mrb[11].mxu1 }
 0x191   : > { %v4168_v13 = vadd.f32 %v2762_v8, %v975_v59  ;;  %v2765_v14 = vadd.f32 %v2764_v11, %v2763_v9 }
 0x193   : > { %v4170_v15 = vadd.f32 %v2765_v14, %v978_v0 }
 0x195   : > { %v2766_v16 = vpop.f32.mrb[12].mxu0  ;;  %v3086_v17 = vpop.f32.mrb[12].mxu1 }
 0x196   : > { %v2767_v18 = vpop.f32.mrb[13].mxu0  ;;  %v1007_v19 = vpop.f32.mrb[13].mxu1 }
 0x197   : > { %v2768_v20 = vadd.f32 %v2767_v18, %v2766_v16  ;;  %v2769_v21 = vpop.f32.mrb[14].mxu0  ;;  %v3087_v22 = vpop.f32.mrb[14].mxu1 }
 0x198   : > { %v2770_v25 = vpop.f32.mrb[15].mxu0  ;;  %v1010_v26 = vpop.f32.mrb[15].mxu1 }
 0x199   : > { %v4172_v28 = vadd.f32 %v3078_v57, %v2768_v20  ;;  %v2771_v30 = vadd.f32 %v2770_v25, %v2769_v21 }
 0x19b   : > { %v4174_v33 = vadd.f32 %v3079_v62, %v2771_v30 }
 0x19d   : > { %v2772_v34 = vpop.f32.mrb[16].mxu0  ;;  %v4176_v37 = vpop.f32.mrb[16].mxu1 }
 0x19e   : > { %v2773_v40 = vpop.f32.mrb[17].mxu0  ;;  %v1023_v41 = vpop.f32.mrb[17].mxu1 }
 0x19f   : > { %v2774_v42 = vadd.f32 %v2773_v40, %v2772_v34  ;;  %v2775_v44 = vpop.f32.mrb[18].mxu0  ;;  %v4178_v48 = vpop.f32.mrb[18].mxu1 }
 0x1a0   : > { %v2776_v49 = vpop.f32.mrb[19].mxu0  ;;  %v1026_v50 = vpop.f32.mrb[19].mxu1 }
 0x1a1   : > { %v4180_v55 = vadd.f32 %v2774_v42, %v991_v7  ;;  %v2777_v23 = vadd.f32 %v2776_v49, %v2775_v44 }
 0x1a3   : > { %v4182_v27 = vadd.f32 %v2777_v23, %v994_v12 }
 0x1a5   : > { %v2778_v31 = vpop.f32.mrb[20].mxu0  ;;  %v4184_v35 = vpop.f32.mrb[20].mxu1 }
 0x1a6   : > { %v2779_v38 = vpop.f32.mrb[21].mxu0  ;;  %v4186_v43 = vpop.f32.mrb[21].mxu1 }
 0x1a7   : > { %v2780_v24 = vadd.f32 %v2779_v38, %v2778_v31  ;;  %v2781_v29 = vpop.f32.mrb[22].mxu0  ;;  %v4188_v32 = vpop.f32.mrb[22].mxu1 }
 0x1a8   : > { %v2782_v36 = vpop.f32.mrb[23].mxu0  ;;  %v4190_v39 = vpop.f32.mrb[23].mxu1 }
 0x1a9   : > { %v4192_v45 = vadd.f32 %v3082_v4, %v2780_v24  ;;  %v2783_v46 = vadd.f32 %v2782_v36, %v2781_v29 }
 0x1ab   : > { %v4194_v47 = vadd.f32 %v3083_v10, %v2783_v46 }
 0x1ad   : > { %v2784_v51 = vpop.f32.mrb[24].mxu0  ;;  %v2856_v53 = vpop.f32.mrb[24].mxu1 }
 0x1ae   : > { %v2785_v56 = vpop.f32.mrb[25].mxu0  ;;  %v2857_v57 = vpop.f32.mrb[25].mxu1 }
 0x1af   : > { %v2786_v58 = vadd.f32 %v2785_v56, %v2784_v51  ;;  %v2787_v59 = vpop.f32.mrb[26].mxu0  ;;  %v4196_v60 = vadd.f32 %v2857_v57, %v2856_v53  ;;  %v2859_v61 = vpop.f32.mrb[26].mxu1 }
 0x1b0   : > { %v2788_v62 = vpop.f32.mrb[27].mxu0  ;;  %v2860_v63 = vpop.f32.mrb[27].mxu1 }
 0x1b1   : > { %v4198_v0 = vadd.f32 %v2786_v58, %v1007_v19  ;;  %v2789_v2 = vadd.f32 %v2788_v62, %v2787_v59  ;;  %v4200_v5 = vadd.f32 %v2860_v63, %v2859_v61 }
 0x1b3   : > { %v4202_v4 = vadd.f32 %v2789_v2, %v1010_v26 }
 0x1b5   : > { %v2790_v6 = vpop.f32.mrb[28].mxu0  ;;  %v2862_v7 = vpop.f32.mrb[28].mxu1 }
 0x1b6   : > { %v2791_v8 = vpop.f32.mrb[29].mxu0  ;;  %v2863_v9 = vpop.f32.mrb[29].mxu1 }
 0x1b7   : > { %v2792_v10 = vadd.f32 %v2791_v8, %v2790_v6  ;;  %v2793_v11 = vpop.f32.mrb[30].mxu0  ;;  %v4204_v12 = vadd.f32 %v2863_v9, %v2862_v7  ;;  %v2865_v14 = vpop.f32.mrb[30].mxu1 }
 0x1b8   : > { %v2794_v16 = vpop.f32.mrb[31].mxu0  ;;  %v2866_v18 = vpop.f32.mrb[31].mxu1 }
 0x1b9   : > { %v4206_v20 = vadd.f32 %v3086_v17, %v2792_v10  ;;  %v2795_v19 = vadd.f32 %v2794_v16, %v2793_v11  ;;  %v4208_v21 = vadd.f32 %v2866_v18, %v2865_v14 }
 0x1bb   : > { %v4210_v25 = vadd.f32 %v3087_v22, %v2795_v19 }
 0x1bd   : > { %v2796_v26 = vpop.f32.mrb[32].mxu0  ;;  %v2868_v30 = vpop.f32.mrb[32].mxu1 }
 0x1be   : > { %v2797_v34 = vpop.f32.mrb[33].mxu0  ;;  %v2869_v40 = vpop.f32.mrb[33].mxu1 }
 0x1bf   : > { %v2798_v42 = vadd.f32 %v2797_v34, %v2796_v26  ;;  %v2799_v44 = vpop.f32.mrb[34].mxu0  ;;  %v4212_v49 = vadd.f32 %v2869_v40, %v2868_v30  ;;  %v2871_v23 = vpop.f32.mrb[34].mxu1 }
 0x1c0   : > { %v2800_v31 = vpop.f32.mrb[35].mxu0  ;;  %v2872_v38 = vpop.f32.mrb[35].mxu1 }
 0x1c1   : > { %v4214_v24 = vadd.f32 %v2798_v42, %v1023_v41  ;;  %v2801_v17 = vadd.f32 %v2800_v31, %v2799_v44  ;;  %v4216_v29 = vadd.f32 %v2872_v38, %v2871_v23 }
 0x1c3   : > { %v4218_v36 = vadd.f32 %v2801_v17, %v1026_v50 }
 0x1c5   : > { %v2802_v22 = vpop.f32.mrb[36].mxu0  ;;  %v2874_v46 = vpop.f32.mrb[36].mxu1 }
 0x1c6   : > { %v2803_v51 = vpop.f32.mrb[37].mxu0  ;;  %v2875_v53 = vpop.f32.mrb[37].mxu1 }
 0x1c7   : > { %v2804_v56 = vadd.f32 %v2803_v51, %v2802_v22  ;;  %v2805_v57 = vpop.f32.mrb[38].mxu0  ;;  %v4220_v58 = vadd.f32 %v2875_v53, %v2874_v46  ;;  %v2877_v59 = vpop.f32.mrb[38].mxu1 }
 0x1c8   : > { %v2806_v61 = vpop.f32.mrb[39].mxu0  ;;  %v2878_v62 = vpop.f32.mrb[39].mxu1 }
 0x1c9   : > { %v4223_v63 = vadd.f32 %v4176_v37, %v2804_v56  ;;  %v2807_v41 = vadd.f32 %v2806_v61, %v2805_v57  ;;  %v4225_v2 = vadd.f32 %v2878_v62, %v2877_v59 }
 0x1cb   : > { %v4228_v50 = vadd.f32 %v4178_v48, %v2807_v41 }
 0x1cd   : > { %v2808_v6 = vpop.f32.mrb[40].mxu0  ;;  %v2880_v7 = vpop.f32.mrb[40].mxu1 }
 0x1ce   : > { %v2809_v8 = vpop.f32.mrb[41].mxu0  ;;  %v2881_v9 = vpop.f32.mrb[41].mxu1 }
 0x1cf   : > { %v2810_v10 = vadd.f32 %v2809_v8, %v2808_v6  ;;  %v2811_v11 = vpop.f32.mrb[42].mxu0  ;;  %v4230_v14 = vadd.f32 %v2881_v9, %v2880_v7  ;;  %v2883_v16 = vpop.f32.mrb[42].mxu1 }
 0x1d0   : > { %v2812_v18 = vpop.f32.mrb[43].mxu0  ;;  %v2884_v19 = vpop.f32.mrb[43].mxu1 }
 0x1d1   : > { %v4233_v37 = vadd.f32 %v2810_v10, %v4186_v43  ;;  %v2813_v26 = vadd.f32 %v2812_v18, %v2811_v11  ;;  %v4235_v30 = vadd.f32 %v2884_v19, %v2883_v16 }
 0x1d3   : > { %v4238_v48 = vadd.f32 %v2813_v26, %v4190_v39 }
 0x1d5   : > { %v2814_v34 = vpop.f32.mrb[44].mxu0  ;;  %v2886_v40 = vpop.f32.mrb[44].mxu1 }
 0x1d6   : > { %v2815_v42 = vpop.f32.mrb[45].mxu0  ;;  %v2887_v44 = vpop.f32.mrb[45].mxu1 }
 0x1d7   : > { %v2816_v23 = vadd.f32 %v2815_v42, %v2814_v34  ;;  %v2817_v31 = vpop.f32.mrb[46].mxu0  ;;  %v2888_v38 = vadd.f32 %v2887_v44, %v2886_v40  ;;  %v2889_v17 = vpop.f32.mrb[46].mxu1 }
 0x1d8   : > { %v2818_v22 = vpop.f32.mrb[47].mxu0  ;;  %v2890_v46 = vpop.f32.mrb[47].mxu1 }
 0x1d9   : > { %v4241_v51 = vadd.f32 %v4184_v35, %v2816_v23  ;;  %v2819_v43 = vadd.f32 %v2818_v22, %v2817_v31  ;;  %v4243_v53 = vadd.f32 %v2890_v46, %v2889_v17 }
 0x1db   : > { %v1051_v56 = vadd.f32 %v4188_v32, %v2819_v43 }
 0x1dd   : > { %1077 = vst [vmem:[#allocation3 + $0xb8] sm:$0xff] %v1051_v56  ;;  %v3114_v39 = vpop.f32.mrb[48].mxu0  ;;  %v2892_v57 = vpop.f32.mrb[48].mxu1 }
 0x1de   : > { %v1443_v59 = vadd.f32 %v3114_v39, %v4204_v12  ;;  %v1434_v61 = vpop.f32.mrb[49].mxu0  ;;  %v2893_v62 = vpop.f32.mrb[49].mxu1 }
 0x1df   : > { %v1435_v41 = vadd.f32 %v4196_v60, %v1434_v61  ;;  %v4248_v6 = vadd.f32 %v2893_v62, %v2892_v57  ;;  %v3115_v7 = vpop.f32.mrb[50].mxu0  ;;  %v2895_v8 = vpop.f32.mrb[50].mxu1 }
 0x1e0   : > { %v1446_v35 = vadd.f32 %v3115_v7, %v4208_v21  ;;  %v1437_v9 = vpop.f32.mrb[51].mxu0  ;;  %v2896_v10 = vpop.f32.mrb[51].mxu1  ;;  %v1581_v16 = vrot.slane %v1443_v59, 1 }
 0x1e1   : > { %v1438_v32 = vadd.f32 %v4200_v5, %v1437_v9  ;;  %v4252_v11 = vadd.f32 %v2896_v10, %v2895_v8  ;;  %v1578_v12 = vrot.slane %v1435_v41, 1 }
 0x1e2   : > { %v1583_v18 = vrot.slane %v1446_v35, 1 }
 0x1e3   : > { %v1579_v19 = vrot.slane %v1438_v32, 1 }
 0x1e4   : > { %v1584_v26 = vsel %vm1577_vm0, %v1581_v16, %v1583_v18 }
 0x1e5   : > { %v4256_v60 = vadd.f32 %v1584_v26, %v4164_v1  ;;  %v1580_v34 = vsel %vm1577_vm0, %v1578_v12, %v1579_v19  ;;  %v1582_v21 = vsel %vm1577_vm0, %v1579_v19, %v1581_v16  ;;  %v3118_v40 = vpop.f32.mrb[52].mxu0  ;;  %v2898_v42 = vpop.f32.mrb[52].mxu1 }
 0x1e6   : > { %v4261_v44 = vadd.f32 %v1580_v34, %v4158_v52  ;;  %v4264_v5 = vadd.f32 %v1582_v21, %v4162_v54  ;;  %v1459_v23 = vadd.f32 %v3118_v40, %v4220_v58  ;;  %v1450_v31 = vpop.f32.mrb[53].mxu0  ;;  %v2899_v17 = vpop.f32.mrb[53].mxu1 }
 0x1e7   : > { %v1451_v22 = vadd.f32 %v4212_v49, %v1450_v31  ;;  %v2900_v1 = vadd.f32 %v2899_v17, %v2898_v42  ;;  %v3119_v46 = vpop.f32.mrb[54].mxu0  ;;  %v2901_v43 = vpop.f32.mrb[54].mxu1 }
 0x1e8   : > { %v1462_v56 = vadd.f32 %v3119_v46, %v4225_v2  ;;  %v1453_v39 = vpop.f32.mrb[55].mxu0  ;;  %v2902_v57 = vpop.f32.mrb[55].mxu1  ;;  %v1589_v62 = vrot.slane %v1459_v23, 1 }
 0x1e9   : > { %v1585_v59 = vrot.slane %v1451_v22, 1  ;;  %v1454_v52 = vadd.f32 %v4216_v29, %v1453_v39  ;;  %v2903_v61 = vadd.f32 %v2902_v57, %v2901_v43 }
 0x1ea   : > { %v1591_v54 = vrot.slane %v1462_v56, 1 }
 0x1eb   : > { %v1586_v41 = vsel %vm1577_vm0, %v1583_v18, %v1585_v59  ;;  %v1587_v58 = vrot.slane %v1454_v52, 1 }
 0x1ec   : > { %v4272_v7 = vadd.f32 %v1586_v41, %v4166_v3  ;;  %v1592_v49 = vsel %vm1577_vm0, %v1589_v62, %v1591_v54 }
 0x1ed   : > { %v4276_v8 = vadd.f32 %v1592_v49, %v4172_v28  ;;  %v1588_v2 = vsel %vm1577_vm0, %v1585_v59, %v1587_v58  ;;  %v1590_v35 = vsel %vm1577_vm0, %v1587_v58, %v1589_v62  ;;  %v3122_v9 = vpop.f32.mrb[56].mxu0  ;;  %v2904_v29 = vpop.f32.mrb[56].mxu1 }
 0x1ee   : > { %v4281_v10 = vadd.f32 %v1588_v2, %v4168_v13  ;;  %v4284_v32 = vadd.f32 %v1590_v35, %v4170_v15  ;;  %v1475_v16 = vadd.f32 %v3122_v9, %v2888_v38  ;;  %v1466_v3 = vpop.f32.mrb[57].mxu0  ;;  %v2905_v18 = vpop.f32.mrb[57].mxu1 }
 0x1ef   : > { %v1467_v12 = vadd.f32 %v4230_v14, %v1466_v3  ;;  %v4287_v19 = vadd.f32 %v2905_v18, %v2904_v29  ;;  %v3123_v28 = vpop.f32.mrb[58].mxu0  ;;  %v2907_v26 = vpop.f32.mrb[58].mxu1 }
 0x1f0   : > { %v1478_v34 = vadd.f32 %v3123_v28, %v4243_v53  ;;  %v1469_v21 = vpop.f32.mrb[59].mxu0  ;;  %v2908_v40 = vpop.f32.mrb[59].mxu1  ;;  %v1597_v15 = vrot.slane %v1475_v16, 1 }
 0x1f1   : > { %v1593_v42 = vrot.slane %v1467_v12, 1  ;;  %v1470_v13 = vadd.f32 %v4235_v30, %v1469_v21  ;;  %v4291_v23 = vadd.f32 %v2908_v40, %v2907_v26 }
 0x1f2   : > { %v1599_v31 = vrot.slane %v1478_v34, 1 }
 0x1f3   : > { %v1594_v38 = vsel %vm1577_vm0, %v1591_v54, %v1593_v42  ;;  %v1595_v17 = vrot.slane %v1470_v13, 1 }
 0x1f4   : > { %v4295_v14 = vadd.f32 %v1594_v38, %v4174_v33  ;;  %v1600_v22 = vsel %vm1577_vm0, %v1597_v15, %v1599_v31 }
 0x1f5   : > { %v4299_v46 = vadd.f32 %v1600_v22, %v4192_v45  ;;  %v1596_v53 = vsel %vm1577_vm0, %v1593_v42, %v1595_v17  ;;  %v1598_v43 = vsel %vm1577_vm0, %v1595_v17, %v1597_v15  ;;  %v3126_v30 = vpop.f32.mrb[60].mxu0  ;;  %v2910_v56 = vpop.f32.mrb[60].mxu1 }
 0x1f6   : > { %v4304_v39 = vadd.f32 %v1596_v53, %v4180_v55  ;;  %v4307_v57 = vadd.f32 %v1598_v43, %v4182_v27  ;;  %v1491_v59 = vadd.f32 %v3126_v30, %v2900_v1  ;;  %v1482_v33 = vpop.f32.mrb[61].mxu0  ;;  %v2911_v52 = vpop.f32.mrb[61].mxu1 }
 0x1f7   : > { %v1483_v62 = vadd.f32 %v4248_v6, %v1482_v33  ;;  %v2912_v54 = vadd.f32 %v2911_v52, %v2910_v56  ;;  %v3127_v45 = vpop.f32.mrb[62].mxu0  ;;  %v2913_v41 = vpop.f32.mrb[62].mxu1 }
 0x1f8   : > { %v1494_v58 = vadd.f32 %v3127_v45, %v2903_v61  ;;  %v1485_v49 = vpop.f32.mrb[63].mxu0  ;;  %v2914_v2 = vpop.f32.mrb[63].mxu1  ;;  %v1605_v55 = vrot.slane %v1491_v59, 1 }
 0x1f9   : > { %v1601_v35 = vrot.slane %v1483_v62, 1  ;;  %v1486_v9 = vadd.f32 %v4252_v11, %v1485_v49  ;;  %v2915_v29 = vadd.f32 %v2914_v2, %v2913_v41 }
 0x1fa   : > { %v1607_v16 = vrot.slane %v1494_v58, 1 }
 0x1fb   : > { %v1602_v27 = vsel %vm1577_vm0, %v1599_v31, %v1601_v35  ;;  %v1603_v3 = vrot.slane %v1486_v9, 1 }
 0x1fc   : > { %v4313_v1 = vadd.f32 %v1602_v27, %v4194_v47  ;;  %v1608_v6 = vsel %vm1577_vm0, %v1605_v55, %v1607_v16 }
 0x1fd   : > { %v4317_v18 = vadd.f32 %v1608_v6, %v4206_v20  ;;  %v1604_v61 = vsel %vm1577_vm0, %v1601_v35, %v1603_v3  ;;  %v1606_v12 = vsel %vm1577_vm0, %v1603_v3, %v1605_v55  ;;  %v2964_v28 = vpop.f32.mrb[64].mxu0  ;;  %v2916_v11 = vpop.f32.mrb[64].mxu1 }
 0x1fe   : > { %v4322_v26 = vadd.f32 %v1604_v61, %v4198_v0  ;;  %v4325_v34 = vadd.f32 %v1606_v12, %v4202_v4  ;;  %v2965_v21 = vpop.f32.mrb[65].mxu0  ;;  %v2917_v47 = vpop.f32.mrb[65].mxu1 }
 0x1ff   : > { %v4327_v40 = vadd.f32 %v2965_v21, %v2964_v28  ;;  %v2918_v42 = vadd.f32 %v2917_v47, %v2916_v11  ;;  %v2967_v13 = vpop.f32.mrb[66].mxu0  ;;  %v2919_v20 = vpop.f32.mrb[66].mxu1 }
 0x200   : > { %v2968_v15 = vpop.f32.mrb[67].mxu0  ;;  %v2920_v31 = vpop.f32.mrb[67].mxu1 }
 0x201   : > { %v4329_v38 = vadd.f32 %v2968_v15, %v2967_v13  ;;  %v2921_v17 = vadd.f32 %v2920_v31, %v2919_v20 }
 0x205   : > { %v2970_v22 = vpop.f32.mrb[68].mxu0  ;;  %v2922_v53 = vpop.f32.mrb[68].mxu1 }
 0x206   : > { %v2971_v43 = vpop.f32.mrb[69].mxu0  ;;  %v2923_v0 = vpop.f32.mrb[69].mxu1 }
 0x207   : > { %v4331_v30 = vadd.f32 %v2971_v43, %v2970_v22  ;;  %v2924_v4 = vadd.f32 %v2923_v0, %v2922_v53  ;;  %v2973_v56 = vpop.f32.mrb[70].mxu0  ;;  %v2925_v59 = vpop.f32.mrb[70].mxu1 }
 0x208   : > { %v2974_v33 = vpop.f32.mrb[71].mxu0  ;;  %v2926_v52 = vpop.f32.mrb[71].mxu1 }
 0x209   : > { %v4333_v62 = vadd.f32 %v2974_v33, %v2973_v56  ;;  %v2927_v45 = vadd.f32 %v2926_v52, %v2925_v59 }
 0x20d   : > { %v3130_v41 = vpop.f32.mrb[72].mxu1  ;;  %v2976_v58 = vpop.f32.mrb[72].mxu0 }
 0x20e   : > { %v1507_v49 = vadd.f32 %v3130_v41, %v2912_v54  ;;  %v1498_v2 = vpop.f32.mrb[73].mxu1  ;;  %v2977_v35 = vpop.f32.mrb[73].mxu0 }
 0x20f   : > { %v1499_v9 = vadd.f32 %v4287_v19, %v1498_v2  ;;  %v4336_v55 = vadd.f32 %v2977_v35, %v2976_v58  ;;  %v3131_v27 = vpop.f32.mrb[74].mxu1  ;;  %v2979_v3 = vpop.f32.mrb[74].mxu0 }
 0x210   : > { %v1510_v6 = vadd.f32 %v3131_v27, %v2915_v29  ;;  %v1501_v61 = vpop.f32.mrb[75].mxu1  ;;  %v2980_v12 = vpop.f32.mrb[75].mxu0  ;;  %v1613_v47 = vrot.slane %v1507_v49, 1 }
 0x211   : > { %v1609_v28 = vrot.slane %v1499_v9, 1  ;;  %v1502_v11 = vadd.f32 %v4291_v23, %v1501_v61  ;;  %v4339_v21 = vadd.f32 %v2980_v12, %v2979_v3  ;;  %v1552_v3 = vld [vmem:[#allocation3 + $0xb8] sm:$0x7f] }
 0x212   : > { %v1615_v13 = vrot.slane %v1510_v6, 1 }
 0x213   : > { %v1610_v54 = vsel %vm1577_vm0, %v1607_v16, %v1609_v28  ;;  %v1611_v20 = vrot.slane %v1502_v11, 1 }
 0x214   : > { %v4343_v15 = vadd.f32 %v1610_v54, %v4210_v25  ;;  %v1616_v19 = vsel %vm1577_vm0, %v1613_v47, %v1615_v13 }
 0x215   : > { %v4347_v31 = vadd.f32 %v1616_v19, %v4223_v63  ;;  %v1612_v29 = vsel %vm1577_vm0, %v1609_v28, %v1611_v20  ;;  %v1614_v22 = vsel %vm1577_vm0, %v1611_v20, %v1613_v47  ;;  %v3134_v23 = vpop.f32.mrb[76].mxu1  ;;  %v2982_v53 = vpop.f32.mrb[76].mxu0 }
 0x216   : > { %v4352_v43 = vadd.f32 %v1612_v29, %v4214_v24  ;;  %v4355_v16 = vadd.f32 %v1614_v22, %v4218_v36  ;;  %v1523_v0 = vadd.f32 %v3134_v23, %v2924_v4  ;;  %v1514_v25 = vpop.f32.mrb[77].mxu1  ;;  %v2983_v56 = vpop.f32.mrb[77].mxu0 }
 0x217   : > { %v1515_v59 = vadd.f32 %v2918_v42, %v1514_v25  ;;  %v4357_v33 = vadd.f32 %v2983_v56, %v2982_v53  ;;  %v3135_v63 = vpop.f32.mrb[78].mxu1  ;;  %v2985_v52 = vpop.f32.mrb[78].mxu0 }
 0x218   : > { %v1526_v41 = vadd.f32 %v3135_v63, %v2927_v45  ;;  %v1517_v58 = vpop.f32.mrb[79].mxu1  ;;  %v2986_v49 = vpop.f32.mrb[79].mxu0  ;;  %v1621_v24 = vrot.slane %v1523_v0, 1 }
 0x219   : > { %v1617_v2 = vrot.slane %v1515_v59, 1  ;;  %v1518_v35 = vadd.f32 %v2921_v17, %v1517_v58  ;;  %v4359_v9 = vadd.f32 %v2986_v49, %v2985_v52 }
 0x21a   : > { %v1623_v27 = vrot.slane %v1526_v41, 1 }
 0x21b   : > { %v1618_v36 = vsel %vm1577_vm0, %v1615_v13, %v1617_v2  ;;  %v1619_v4 = vrot.slane %v1518_v35, 1 }
 0x21c   : > { %v4363_v6 = vadd.f32 %v1618_v36, %v4228_v50  ;;  %v1624_v42 = vsel %vm1577_vm0, %v1621_v24, %v1623_v27  ;;  %v1672_v61 = vadd.f32 %v1623_v27, %v1552_v3 }
 0x21d   : > { %v4367_v45 = vadd.f32 %v1624_v42, %v4241_v51  ;;  %v1620_v12 = vsel %vm1577_vm0, %v1617_v2, %v1619_v4  ;;  %v1622_v17 = vsel %vm1577_vm0, %v1619_v4, %v1621_v24  ;;  %v2988_v28 = vpop.f32.mrb[80].mxu0  ;;  %v4399_v42 = vld [vmem:[#allocation9] ss:$0 sm:$0xff] }
 0x21e   : > { %1696 = vst [vmem:[#allocation3 + $0xb8] sm:$0x7f] %v1672_v61  ;;  %v4372_v11 = vadd.f32 %v1620_v12, %v4233_v37  ;;  %v4375_v47 = vadd.f32 %v1622_v17, %v4238_v48  ;;  %v2989_v50 = vpop.f32.mrb[81].mxu0 }
 0x21f   : > { %v4377_v13 = vadd.f32 %v2989_v50, %v2988_v28  ;;  %v2991_v54 = vpop.f32.mrb[82].mxu0 }
 0x220   : > { %v2992_v20 = vpop.f32.mrb[83].mxu0 }
 0x221   : > { %v4379_v19 = vadd.f32 %v2992_v20, %v2991_v54 }
 0x225   : > { %v2994_v51 = vpop.f32.mrb[84].mxu0 }
 0x226   : > { %v2995_v29 = vpop.f32.mrb[85].mxu0 }
 0x227   : > { %v4381_v22 = vadd.f32 %v2995_v29, %v2994_v51  ;;  %v2997_v23 = vpop.f32.mrb[86].mxu0 }
 0x228   : > { %v2998_v53 = vpop.f32.mrb[87].mxu0 }
 0x229   : > { %v4383_v0 = vadd.f32 %v2998_v53, %v2997_v23 }
 0x22d   : > { %v3154_v37 = vpop.f32.mrb[80].mxu1  ;;  %v3000_v25 = vpop.f32.mrb[88].mxu0 }
 0x22e   : > { %v2062_v48 = vadd.f32 %v3154_v37, %v4331_v30  ;;  %v2053_v56 = vpop.f32.mrb[81].mxu1  ;;  %v3001_v59 = vpop.f32.mrb[89].mxu0 }
 0x22f   : > { %v2054_v63 = vadd.f32 %v4327_v40, %v2053_v56  ;;  %v4387_v52 = vadd.f32 %v3001_v59, %v3000_v25  ;;  %v3155_v41 = vpop.f32.mrb[82].mxu1  ;;  %v3003_v58 = vpop.f32.mrb[90].mxu0 }
 0x230   : > { %v2065_v49 = vadd.f32 %v3155_v41, %v4333_v62  ;;  %v2056_v2 = vpop.f32.mrb[83].mxu1  ;;  %v3004_v35 = vpop.f32.mrb[91].mxu0  ;;  %v2200_v30 = vrot.slane %v2062_v48, 2 }
 0x231   : > { %v2057_v24 = vadd.f32 %v4329_v38, %v2056_v2  ;;  %v4392_v27 = vadd.f32 %v3004_v35, %v3003_v58  ;;  %v2197_v3 = vrot.slane %v2054_v63, 2 }
 0x232   : > { %v2202_v36 = vrot.slane %v2065_v49, 2 }
 0x233   : > { %v2198_v4 = vrot.slane %v2057_v24, 2 }
 0x234   : > { %v2203_v40 = vsel %vm2196_vm1, %v2200_v30, %v2202_v36 }
 0x235   : > { %v2270_v62 = vadd.f32 %v2203_v40, %v4256_v60  ;;  %v2199_v61 = vsel %vm2196_vm1, %v2197_v3, %v2198_v4  ;;  %v2201_v12 = vsel %vm2196_vm1, %v2198_v4, %v2200_v30  ;;  %v3158_v38 = vpop.f32.mrb[84].mxu1  ;;  %v3006_v17 = vpop.f32.mrb[92].mxu0 }
 0x236   : > { %v2268_v28 = vadd.f32 %v2199_v61, %v4261_v44  ;;  %v2269_v50 = vadd.f32 %v2201_v12, %v4264_v5  ;;  %v2078_v54 = vadd.f32 %v3158_v38, %v4357_v33  ;;  %v2069_v20 = vpop.f32.mrb[85].mxu1  ;;  %v3007_v51 = vpop.f32.mrb[93].mxu0 }
 0x237   : > { %v2349_v29 = vadd.f32 %v4399_v42, %v2270_v62  ;;  %v2070_v23 = vadd.f32 %v4336_v55, %v2069_v20  ;;  %v4409_v53 = vadd.f32 %v3007_v51, %v3006_v17  ;;  %v3159_v60 = vpop.f32.mrb[86].mxu1  ;;  %v3009_v37 = vpop.f32.mrb[94].mxu0 }
 0x238   : > { %v2347_v25 = vadd.f32 %v4399_v42, %v2268_v28  ;;  %v2348_v48 = vadd.f32 %v4399_v42, %v2269_v50  ;;  %v2081_v44 = vadd.f32 %v3159_v60, %v4359_v9  ;;  %v2072_v5 = vpop.f32.mrb[87].mxu1  ;;  %v3010_v56 = vpop.f32.mrb[95].mxu0  ;;  %v2208_v49 = vrot.slane %v2078_v54, 2 }
 0x239   : > { %v2373_v33 = vmax.f32 %v2349_v29, 0.0  ;;  %v2204_v59 = vrot.slane %v2070_v23, 2  ;;  %v2073_v63 = vadd.f32 %v4339_v21, %v2072_v5  ;;  %v4415_v41 = vadd.f32 %v3010_v56, %v3009_v37 }
 0x23a   : > { %v2371_v55 = vmax.f32 %v2347_v25, 0.0  ;;  %v2372_v58 = vmax.f32 %v2348_v48, 0.0  ;;  %v2210_v2 = vrot.slane %v2081_v44, 2 }
 0x23b   : > { %2397 = vst [vmem:[%s4418_s29 + $0x10] sm:$0xff] %v2373_v33  ;;  %v2205_v9 = vsel %vm2196_vm1, %v2202_v36, %v2204_v59  ;;  %v2206_v35 = vrot.slane %v2073_v63, 2 }
 0x23c   : > { %2395 = vst [vmem:[%s4418_s29] sm:$0xff] %v2371_v55  ;;  %2396 = vst [vmem:[%s4418_s29 + $0x8] sm:$0xff] %v2372_v58  ;;  %v2271_v24 = vadd.f32 %v2205_v9, %v4272_v7  ;;  %v2211_v21 = vsel %vm2196_vm1, %v2208_v49, %v2210_v2 }
 0x23d   : > { %v2274_v30 = vadd.f32 %v2211_v21, %v4276_v8  ;;  %v2207_v3 = vsel %vm2196_vm1, %v2204_v59, %v2206_v35  ;;  %v2209_v4 = vsel %vm2196_vm1, %v2206_v35, %v2208_v49  ;;  %v3162_v40 = vpop.f32.mrb[88].mxu1  ;;  %v3012_v62 = vpop.f32.mrb[96].mxu0 }
 0x23e   : > { %v2350_v61 = vadd.f32 %v4399_v42, %v2271_v24  ;;  %v2272_v12 = vadd.f32 %v2207_v3, %v4281_v10  ;;  %v2273_v36 = vadd.f32 %v2209_v4, %v4284_v32  ;;  %v2094_v38 = vadd.f32 %v3162_v40, %v4381_v22  ;;  %v2085_v17 = vpop.f32.mrb[89].mxu1  ;;  %v3013_v7 = vpop.f32.mrb[97].mxu0 }
 0x23f   : > { %v2353_v28 = vadd.f32 %v4399_v42, %v2274_v30  ;;  %v2086_v8 = vadd.f32 %v4377_v13, %v2085_v17  ;;  %v4435_v50 = vadd.f32 %v3013_v7, %v3012_v62  ;;  %v3163_v54 = vpop.f32.mrb[90].mxu1  ;;  %v3015_v20 = vpop.f32.mrb[98].mxu0 }
 0x240   : > { %v2374_v51 = vmax.f32 %v2350_v61, 0.0  ;;  %v2351_v29 = vadd.f32 %v4399_v42, %v2272_v12  ;;  %v2352_v10 = vadd.f32 %v4399_v42, %v2273_v36  ;;  %v2088_v32 = vpop.f32.mrb[91].mxu1  ;;  %v3016_v22 = vpop.f32.mrb[99].mxu0  ;;  %v2097_v37 = vadd.f32 %v3163_v54, %v4383_v0 }
 0x241   : > { %v2377_v23 = vmax.f32 %v2353_v28, 0.0  ;;  %v2212_v60 = vrot.slane %v2086_v8, 2  ;;  %v2089_v13 = vadd.f32 %v4379_v19, %v2088_v32  ;;  %v4442_v44 = vadd.f32 %v3016_v22, %v3015_v20 }
 0x242   : > { %2398 = vst [vmem:[%s4418_s29 + $0x18] sm:$0xff] %v2374_v51  ;;  %v2375_v25 = vmax.f32 %v2351_v29, 0.0  ;;  %v2376_v48 = vmax.f32 %v2352_v10, 0.0  ;;  %v2216_v5 = vrot.slane %v2094_v38, 2  ;;  %v2218_v33 = vrot.slane %v2097_v37, 2 }
 0x243   : > { %2401 = vst [vmem:[%s4418_s29 + $0x30] sm:$0xff] %v2377_v23  ;;  %v2213_v56 = vsel %vm2196_vm1, %v2210_v2, %v2212_v60  ;;  %v2214_v59 = vrot.slane %v2089_v13, 2 }
 0x244   : > { %2399 = vst [vmem:[%s4418_s29 + $0x20] sm:$0xff] %v2375_v25  ;;  %2400 = vst [vmem:[%s4418_s29 + $0x28] sm:$0xff] %v2376_v48  ;;  %v2275_v63 = vadd.f32 %v2213_v56, %v4295_v14  ;;  %v2219_v55 = vsel %vm2196_vm1, %v2216_v5, %v2218_v33 }
 0x245   : > { %v2215_v0 = vsel %vm2196_vm1, %v2212_v60, %v2214_v59  ;;  %v2217_v19 = vsel %vm2196_vm1, %v2214_v59, %v2216_v5  ;;  %v3166_v58 = vpop.f32.mrb[92].mxu1  ;;  %v3018_v49 = vpop.f32.mrb[100].mxu0  ;;  %v2278_v35 = vadd.f32 %v2219_v55, %v4299_v46 }
 0x246   : > { %v2354_v9 = vadd.f32 %v4399_v42, %v2275_v63  ;;  %v2276_v2 = vadd.f32 %v2215_v0, %v4304_v39  ;;  %v2277_v24 = vadd.f32 %v2217_v19, %v4307_v57  ;;  %v2101_v21 = vpop.f32.mrb[93].mxu1  ;;  %v3019_v30 = vpop.f32.mrb[101].mxu0  ;;  %v2110_v14 = vadd.f32 %v3166_v58, %v4409_v53 }
 0x247   : > { %v2102_v3 = vadd.f32 %v4387_v52, %v2101_v21  ;;  %v3020_v4 = vadd.f32 %v3019_v30, %v3018_v49  ;;  %v3167_v40 = vpop.f32.mrb[94].mxu1  ;;  %v3021_v62 = vpop.f32.mrb[102].mxu0  ;;  %v2357_v12 = vadd.f32 %v4399_v42, %v2278_v35 }
 0x248   : > { %v2378_v61 = vmax.f32 %v2354_v9, 0.0  ;;  %v2355_v36 = vadd.f32 %v4399_v42, %v2276_v2  ;;  %v2356_v46 = vadd.f32 %v4399_v42, %v2277_v24  ;;  %v2104_v39 = vpop.f32.mrb[95].mxu1  ;;  %v3022_v57 = vpop.f32.mrb[103].mxu0  ;;  %v2113_v53 = vadd.f32 %v3167_v40, %v4415_v41 }
 0x249   : > { %v2220_v38 = vrot.slane %v2102_v3, 2  ;;  %v2105_v52 = vadd.f32 %v4392_v27, %v2104_v39  ;;  %v2381_v17 = vmax.f32 %v2357_v12, 0.0  ;;  %v3023_v8 = vadd.f32 %v3022_v57, %v3021_v62 }
 0x24a   : > { %2402 = vst [vmem:[%s4418_s29 + $0x38] sm:$0xff] %v2378_v61  ;;  %v2379_v7 = vmax.f32 %v2355_v36, 0.0  ;;  %v2380_v28 = vmax.f32 %v2356_v46, 0.0  ;;  %v2224_v54 = vrot.slane %v2110_v14, 2  ;;  %v2226_v51 = vrot.slane %v2113_v53, 2 }
 0x24b   : > { %v2221_v20 = vsel %vm2196_vm1, %v2218_v33, %v2220_v38  ;;  %v2222_v29 = vrot.slane %v2105_v52, 2  ;;  %2405 = vst [vmem:[%s4418_s29 + $0x50] sm:$0xff] %v2381_v17 }
 0x24c   : > { %2403 = vst [vmem:[%s4418_s29 + $0x40] sm:$0xff] %v2379_v7  ;;  %2404 = vst [vmem:[%s4418_s29 + $0x48] sm:$0xff] %v2380_v28  ;;  %v2279_v10 = vadd.f32 %v2221_v20, %v4313_v1  ;;  %v2227_v32 = vsel %vm2196_vm1, %v2224_v54, %v2226_v51 }
 0x24d   : > { %v2223_v41 = vsel %vm2196_vm1, %v2220_v38, %v2222_v29  ;;  %v2225_v27 = vsel %vm2196_vm1, %v2222_v29, %v2224_v54  ;;  %v3170_v22 = vpop.f32.mrb[96].mxu1  ;;  %v3024_v23 = vpop.f32.mrb[104].mxu0  ;;  %v2282_v37 = vadd.f32 %v2227_v32, %v4317_v18 }
 0x24e   : > { %v2358_v60 = vadd.f32 %v4399_v42, %v2279_v10  ;;  %v2280_v13 = vadd.f32 %v2223_v41, %v4322_v26  ;;  %v2281_v25 = vadd.f32 %v2225_v27, %v4325_v34  ;;  %v2117_v48 = vpop.f32.mrb[97].mxu1  ;;  %v3025_v5 = vpop.f32.mrb[105].mxu0  ;;  %v2126_v1 = vadd.f32 %v3170_v22, %v3020_v4 }
 0x24f   : > { %v2118_v56 = vadd.f32 %v4435_v50, %v2117_v48  ;;  %v3026_v33 = vadd.f32 %v3025_v5, %v3024_v23  ;;  %v3171_v59 = vpop.f32.mrb[98].mxu1  ;;  %v3027_v63 = vpop.f32.mrb[106].mxu0  ;;  %v2361_v0 = vadd.f32 %v4399_v42, %v2282_v37 }
 0x250   : > { %v2382_v55 = vmax.f32 %v2358_v60, 0.0  ;;  %v2359_v19 = vadd.f32 %v4399_v42, %v2280_v13  ;;  %v2360_v18 = vadd.f32 %v4399_v42, %v2281_v25  ;;  %v2120_v26 = vpop.f32.mrb[99].mxu1  ;;  %v3028_v34 = vpop.f32.mrb[107].mxu0  ;;  %v2129_v49 = vadd.f32 %v3171_v59, %v3023_v8  ;;  %v2171_v59 = vld [vmem:[#allocation3 + $0xb8] sm:$0x3f] }
 0x251   : > { %v2228_v58 = vrot.slane %v2118_v56, 2  ;;  %v2121_v9 = vadd.f32 %v4442_v44, %v2120_v26  ;;  %v2385_v50 = vmax.f32 %v2361_v0, 0.0  ;;  %v3029_v24 = vadd.f32 %v3028_v34, %v3027_v63 }
 0x252   : > { %2406 = vst [vmem:[%s4418_s29 + $0x58] sm:$0xff] %v2382_v55  ;;  %v2383_v35 = vmax.f32 %v2359_v19, 0.0  ;;  %v2384_v2 = vmax.f32 %v2360_v18, 0.0  ;;  %v2232_v21 = vrot.slane %v2126_v1, 2  ;;  %v2234_v14 = vrot.slane %v2129_v49, 2 }
 0x253   : > { %v2229_v30 = vsel %vm2196_vm1, %v2226_v51, %v2228_v58  ;;  %v2230_v3 = vrot.slane %v2121_v9, 2  ;;  %2409 = vst [vmem:[%s4418_s29 + $0x70] sm:$0xff] %v2385_v50 }
 0x254   : > { %2407 = vst [vmem:[%s4418_s29 + $0x60] sm:$0xff] %v2383_v35  ;;  %2408 = vst [vmem:[%s4418_s29 + $0x68] sm:$0xff] %v2384_v2  ;;  %v2283_v4 = vadd.f32 %v2229_v30, %v4343_v15  ;;  %v2235_v40 = vsel %vm2196_vm1, %v2232_v21, %v2234_v14 }
 0x255   : > { %v2231_v62 = vsel %vm2196_vm1, %v2228_v58, %v2230_v3  ;;  %v2233_v44 = vsel %vm2196_vm1, %v2230_v3, %v2232_v21  ;;  %v3174_v61 = vpop.f32.mrb[100].mxu1  ;;  %v3030_v12 = vpop.f32.mrb[108].mxu0  ;;  %v2286_v46 = vadd.f32 %v2235_v40, %v4347_v31 }
 0x256   : > { %v2362_v36 = vadd.f32 %v4399_v42, %v2283_v4  ;;  %v2284_v39 = vadd.f32 %v2231_v62, %v4352_v43  ;;  %v2285_v57 = vadd.f32 %v2233_v44, %v4355_v16  ;;  %v2133_v38 = vpop.f32.mrb[101].mxu1  ;;  %v3031_v53 = vpop.f32.mrb[109].mxu0 }
 0x257   : > { %v2134_v15 = vadd.f32 %v3026_v33, %v2133_v38  ;;  %v3032_v52 = vadd.f32 %v3031_v53, %v3030_v12  ;;  %v3175_v17 = vpop.f32.mrb[102].mxu1  ;;  %v3033_v7 = vpop.f32.mrb[110].mxu0  ;;  %v2365_v8 = vadd.f32 %v4399_v42, %v2286_v46 }
 0x258   : > { %v2386_v28 = vmax.f32 %v2362_v36, 0.0  ;;  %v2363_v54 = vadd.f32 %v4399_v42, %v2284_v39  ;;  %v2364_v20 = vadd.f32 %v4399_v42, %v2285_v57  ;;  %v2136_v31 = vpop.f32.mrb[103].mxu1  ;;  %v3034_v43 = vpop.f32.mrb[111].mxu0 }
 0x259   : > { %v2236_v16 = vrot.slane %v2134_v15, 2  ;;  %v2142_v51 = vadd.f32 %v3174_v61, %v3032_v52  ;;  %v2137_v29 = vadd.f32 %v3029_v24, %v2136_v31  ;;  %v3035_v10 = vadd.f32 %v3034_v43, %v3033_v7 }
 0x25a   : > { %2410 = vst [vmem:[%s4418_s29 + $0x78] sm:$0xff] %v2386_v28  ;;  %v2389_v32 = vmax.f32 %v2365_v8, 0.0  ;;  %v2387_v41 = vmax.f32 %v2363_v54, 0.0  ;;  %v2388_v27 = vmax.f32 %v2364_v20, 0.0 }
 0x25b   : > { %v2237_v22 = vsel %vm2196_vm1, %v2234_v14, %v2236_v16  ;;  %v2240_v23 = vrot.slane %v2142_v51, 2  ;;  %v2238_v60 = vrot.slane %v2137_v29, 2  ;;  %v2145_v37 = vadd.f32 %v3175_v17, %v3035_v10 }
 0x25c   : > { %2413 = vst [vmem:[%s4418_s29 + $0x90] sm:$0xff] %v2389_v32  ;;  %2411 = vst [vmem:[%s4418_s29 + $0x80] sm:$0xff] %v2387_v41  ;;  %v2287_v13 = vadd.f32 %v2237_v22, %v4363_v6 }
 0x25d   : > { %2412 = vst [vmem:[%s4418_s29 + $0x88] sm:$0xff] %v2388_v27  ;;  %v2239_v25 = vsel %vm2196_vm1, %v2236_v16, %v2238_v60  ;;  %v2241_v48 = vsel %vm2196_vm1, %v2238_v60, %v2240_v23  ;;  %v2242_v5 = vrot.slane %v2145_v37, 2 }
 0x25e   : > { %v2366_v1 = vadd.f32 %v4399_v42, %v2287_v13  ;;  %v2288_v56 = vadd.f32 %v2239_v25, %v4372_v11  ;;  %v2289_v33 = vadd.f32 %v2241_v48, %v4375_v47 }
 0x25f   : > { %v2243_v63 = vsel %vm2196_vm1, %v2240_v23, %v2242_v5  ;;  %v2291_v55 = vadd.f32 %v2242_v5, %v2171_v59 }
 0x260   : > { %v2390_v6 = vmax.f32 %v2366_v1, 0.0  ;;  %v2367_v0 = vadd.f32 %v4399_v42, %v2288_v56  ;;  %v2368_v19 = vadd.f32 %v4399_v42, %v2289_v33  ;;  %v2290_v18 = vadd.f32 %v2243_v63, %v4367_v45 }
 0x261   : > { %2315 = vst [vmem:[#allocation3 + $0xb8] sm:$0x3f] %v2291_v55 }
 0x262   : > { %2414 = vst [vmem:[%s4418_s29 + $0x98] sm:$0xff] %v2390_v6  ;;  %v2391_v11 = vmax.f32 %v2367_v0, 0.0  ;;  %v2392_v47 = vmax.f32 %v2368_v19, 0.0  ;;  %v2369_v26 = vadd.f32 %v4399_v42, %v2290_v18 }
 0x264   : > { %2415 = vst [vmem:[%s4418_s29 + $0xa0] sm:$0xff] %v2391_v11  ;;  %2416 = vst [vmem:[%s4418_s29 + $0xa8] sm:$0xff] %v2392_v47  ;;  %v2393_v34 = vmax.f32 %v2369_v26, 0.0 }
 0x266   : > { %2417 = vst [vmem:[%s4418_s29 + $0xb0] sm:$0xff] %v2393_v34 }
 0x268   : > { %v2339_v58 = vld [vmem:[#allocation3 + $0xb8] sm:$0xff] }
 0x269   : > { %v2370_v45 = vadd.f32 %v4399_v42, %v2339_v58 }
 0x26b   : > { %v2394_v49 = vmax.f32 %v2370_v45, 0.0 }
 0x26d   : > { %2418 = vst [vmem:[%s4418_s29 + $0xb8] sm:$0xff] %v2394_v49 }
 0x26e   : > { %3532 = shalt.err (!%p3529_p5)
}
 0x26f   : > { %s3533_s4 = scalar_lea.hbm %s4526_s12, 3072  ;;  %s3537_s27 = scalar_lea.hbm %s4595_s3, 12288 }
 0x270   : > { %p3534_p8 = scmp.ne.s32.totalorder %s4526_s12, %s3533_s4  ;;  %p3538_p6 = scmp.lt.u32.totalorder %s4526_s12, %s4595_s3 }
 0x271   : > { %p3539_p10 = scmp.lt.u32.totalorder %s3537_s27, %s3533_s4  ;;  %p3541_p4 = scmp.lt.u32.totalorder %s3533_s4, %s4526_s12 }
 0x272   : > { %p3535_p12 = pnand %p3534_p8, %p4629_p3 }
 0x273   : > { %p3540_p1 = por %p3539_p10, %p3538_p6 }
 0x274   : > { %p3536_p2 = pneg %p3535_p12 }
 0x275   : > { %p3542_p7 = por %p3541_p4, %p3540_p1 }
 0x277   : > { %p3543_p13 = pnand %p3542_p7, %p3536_p2 }
 0x279   : > { %3546 = shalt.err (!%p3543_p13)
}
 0x27a   : > { %s3653_s26 = smov 128   ;;  %s3654_s24 = smov 8  }
 0x27b   : > { %3208 = dma.vmem_to_hbm [thread:$0]  (%p4629_p3), %s4521_s7, 3072, %s4526_s12, %s4531_s9, %s3653_s26, %s3653_s26, %s3654_s24  }
 0x27c PF: > { %s4630_s8 = sld [smem:[#allocation14_spill]]  ;;  %s4631_s5 = sld [smem:[#allocation16_spill]] }
 0x27d   : > { %p3230_p9 = scmp.ge.s32.totalorder %s3645_s22, 2 }
 0x282   : > { %s2451_s18 = sand.u32 1, %s4630_s8   ;;  %p4632_p11 = scmp.ne.s32.totalorder %s4631_s5, 0 }
 0x283   : > { %s2452_s19 = scalar_lea.sflag [#allocation6], %s2451_s18 }
 0x284   : > { %p3222_p0 = pnand %p3230_p9, %p4632_p11 }
 0x286   : > { %3600 = dma.done.wait (!%p3222_p0), %s2452_s19, 3072  }
 0x287   : > { %3602 = vsyncadd (!%p3222_p0), %s2452_s19, 4294964224  ;;  %s20_s22 = sadd.s32 1, %s3645_s22   ;;  %s4633_s18 = sld [smem:[#allocation15_spill]] }
 0x288   : > { %p17_p5 = scmp.ge.s32.totalorder %s20_s22, 6   ;;  %s4634_s20 = sld [smem:[#allocation17_spill]] }
 0x289   : > { %s4635_s28 = smov %s4649_s15  ;;  %s4636_s12 = smov %s3609_s13 }
 0x28a   : > { %s4637_s13 = smov %s3613_s14  ;;  %s4638_s14 = smov %s3854_s2 }
 0x28b   : > { %s4639_s15 = smov %s3621_s16  ;;  %s4640_s16 = smov %s3625_s17 }
 0x28c   : > { %s4641_s17 = smov %s3849_s10  ;;  %s4642_s19 = smov %s3641_s21 }
 0x28d   : > { %s4643_s21 = smov %s4635_s28  ;;  %19 = sbr.rel (!%p17_p5) target bundleno = 13 (0xd), region = 90 }
 0x294   :  { %2457 = vsyncpa [#allocation5], 1 }
 0x295   :  { %2459 = vsyncpa [#allocation5 + $0x1], 1 }
 0x296   :  { %2460 = vsyncpa [#allocation8], 1 }
 0x297   :  { %2461 = vsyncpa [#allocation6], 1 }
 0x298   :  { %2463 = vsyncpa [#allocation6 + $0x1], 1 }

</bundles_post_ra>
